<compile_context>
chip_gen: v7x
topology: tpu7x:2x2x1
jax: 0.10.0
libtpu: 0.0.40
codegen_flags: <defaults>
</compile_context>

<pallas_src>
import functools

import numpy as np

import jax
import jax.numpy as jnp
from jax import lax
from jax.experimental import pallas as pl
from jax.experimental.pallas import tpu as pltpu


def _round_up(x, m):
    return ((x + m - 1) // m) * m


# ---------------------------------------------------------------------------
# Fused forward-pass kernel (one batch tile per grid step, all VMEM-resident)
# ---------------------------------------------------------------------------
def _fused_cnn_kernel(x1_ref, w1_ref, b1_ref, w2_ref, b2_ref, w3_ref, b3_ref,
                      m12_ref, sel_b_ref, sel_m_ref, padb_ref,
                      out_ref, f2_ref, f3_ref, slab_ref,
                      *, fw, npos, tb, out_lanes):
    h0 = w1_ref.shape[1]
    h1 = w2_ref.shape[1]
    nrows = f2_ref.shape[0]

    # ---- layer 1: ZeroPad2d(2) + Conv(9->h0) + ReLU as ONE MXU matmul over
    #      the host-built im2col slab (bf16 operands, f32 accumulation).
    a1 = jnp.dot(x1_ref[...], w1_ref[...], preferred_element_type=jnp.float32)
    a1 = jnp.maximum(a1 + b1_ref[...], 0.0)                      # (npos, h0) f32

    # ---- re-pad for layer 2 (ZeroPad2d(1)): valid region moves to frame
    #      offset (1,1) = row fw+1.  Zero only border/tail rows; the interior
    #      is fully overwritten (m12 zeroes invalid interior rows).
    f2_ref[0:fw + 1, :] = jnp.zeros((fw + 1, h0), jnp.float32)
    f2_ref[fw + 1:fw + 1 + npos, :] = a1 * m12_ref[...]
    f2_ref[fw + 1 + npos:nrows, :] = jnp.zeros(
        (nrows - (fw + 1 + npos), h0), jnp.float32)

    # ---- layer 2: build the (npos, 9*h0) im2col slab with 9 shifted copies,
    #      then ONE K=9*h0 matmul (instead of 9 small K=h0 matmuls).
    for di in range(3):
        for dj in range(3):
            t = di * 3 + dj
            off = di * fw + dj
            slab_ref[:, t * h0:(t + 1) * h0] = (
                f2_ref[off:off + npos, :].astype(slab_ref.dtype))
    a2 = jnp.dot(slab_ref[...], w2_ref[...], preferred_element_type=jnp.float32)
    a2 = jnp.maximum(a2 + b2_ref[...], 0.0)                      # (npos, h1) f32

    # ---- layer 3: Conv(h1->1) + ReLU.  cout=1 -> VPU multiply-accumulate over
    #      the 9 taps + a single lane reduce; keeps the MXU free.
    f3_ref[0:npos, :] = a2
    f3_ref[npos:nrows, :] = jnp.zeros((nrows - npos, h1), jnp.float32)
    w3 = w3_ref[...]                                             # (9, h1) f32
    acc = f3_ref[0:npos, :] * w3[0:1, :]
    for t in range(1, 9):
        off = (t // 3) * fw + (t % 3)
        acc = acc + f3_ref[off:off + npos, :] * w3[t:t + 1, :]
    y3 = jnp.maximum(jnp.sum(acc, axis=-1, keepdims=True) + b3_ref[...], 0.0)
    # The Conv2d(1,1,1) (w4, b4) is folded into sel_m / padb on the host.

    # ---- gather the io_dim valid pixels per image into lane-dense logits and
    #      apply a fused row softmax (pad lanes carry -1e30 -> exactly 0).
    g = y3 * sel_m_ref[...]                                      # (npos, out_lanes)
    logits = jnp.dot(sel_b_ref[...], g, preferred_element_type=jnp.float32)
    logits = logits + padb_ref[...]                              # (tb, out_lanes)
    mx = jnp.max(logits, axis=1, keepdims=True)
    e = jnp.exp(logits - mx)
    s = jnp.sum(e, axis=1, keepdims=True)
    out_ref[...] = (e * pl.reciprocal(s, approx=True)).reshape(1, tb, out_lanes)


# ---------------------------------------------------------------------------
# Host-side layout plumbing (model-boundary only)
# ---------------------------------------------------------------------------
def _build_im2col_l1(x, fw):
    """NCHW input -> layer-1 im2col slab (B*fw*fw, 9*Cin); ZeroPad2d(2) baked in."""
    b, c, h, _ = x.shape
    pad = (fw - h) // 2
    xp = jnp.pad(x, ((0, 0), (0, 0), (pad, pad), (pad, pad)))    # (B,C,fw,fw)
    xpp = jnp.pad(xp, ((0, 0), (0, 0), (0, 2), (0, 2)))          # guard for tap shifts
    taps = [xpp[:, :, di:di + fw, dj:dj + fw]
            for di in range(3) for dj in range(3)]               # 9 x (B,C,fw,fw)
    arr = jnp.stack(taps, axis=0)                                # (9,B,C,fw,fw)
    arr = jnp.transpose(arr, (1, 3, 4, 0, 2))                    # (B,y,x,tap,C)
    return arr.reshape(b * fw * fw, 9 * c).astype(jnp.bfloat16)


def _tap_weights(w):
    """(Cout, Cin, 3, 3) -> (9*Cin, Cout); rows grouped by tap (di,dj) then Cin."""
    cout, cin, kh, kw = w.shape
    return jnp.transpose(w, (2, 3, 1, 0)).reshape(kh * kw * cin, cout)


def _build_constants(tb, size, io_dim, out_lanes, fw):
    """Per-batch-tile 0/1 masks / selection matrices (built once with numpy)."""
    npos = tb * fw * fw
    p = np.arange(npos)
    b = p // (fw * fw)
    q = p % (fw * fw)
    yy = q // fw
    xx = q % fw

    # m12[p] = 1 iff frame row p + (fw+1) is an interior (pad-1) position of
    # the SAME image (so it receives layer-1 output (y-1, x-1)).
    dest = p + fw + 1
    db = dest // (fw * fw)
    dq = dest % (fw * fw)
    dy = dq // fw
    dx = dq % fw
    m12 = ((db == b) & (dy >= 1) & (dy <= fw - 2) & (dx >= 1) & (dx <= fw - 2))
    m12 = m12.astype(np.float32).reshape(npos, 1)

    valid = (yy < size) & (xx < size)          # final size x size output region
    m_of_p = yy * size + xx

    sel_b = ((p[None, :] // (fw * fw)) == np.arange(tb)[:, None]) & valid[None, :]
    sel_b = sel_b.astype(np.float32)                              # (tb, npos)

    sel_m = (np.arange(out_lanes)[None, :] == m_of_p[:, None]) & valid[:, None]
    sel_m = sel_m.astype(np.float32)                              # (npos, out_lanes)

    lane_valid = np.arange(out_lanes) < io_dim                    # (out_lanes,)
    return m12, sel_b, sel_m, lane_valid


# ---------------------------------------------------------------------------
# Forward pass (== CNN.forward after transform_input)
# ---------------------------------------------------------------------------
def cnn_forward(x, params, io_dim, batch_tile=1):
    B, C, H, _ = x.shape
    size = H
    assert io_dim == size * size and io_dim <= 128
    assert B % batch_tile == 0
    fw = size + 4                      # common frame width for every layer
    # TODO(synk): for board sizes != 4, pad fw up to a multiple of 8 (and
    # regenerate the masks consistently) to keep tap row-shifts sublane-aligned.
    assert fw % 8 == 0

    tb = batch_tile
    nb = B // tb
    npos = tb * fw * fw                # rows of one tile's flattened frame
    nrows = _round_up(npos + 2 * fw + 2, 8)
    out_lanes = 128                    # lane-dense output slab
    h0 = params["w1"].shape[0]
    h1 = params["w2"].shape[0]

    # Host-side layout plumbing.
    x1 = _build_im2col_l1(x, fw)                                   # bf16
    w1f = _tap_weights(params["w1"]).astype(jnp.bfloat16)          # (9*C,  h0)
    w2f = _tap_weights(params["w2"]).astype(jnp.bfloat16)          # (9*h0, h1)
    b1 = params["b1"].reshape(1, h0).astype(jnp.float32)
    b2 = params["b2"].reshape(1, h1).astype(jnp.float32)
    w3v = jnp.transpose(params["w3"][0], (1, 2, 0)).reshape(9, h1).astype(jnp.float32)
    b3 = params["b3"].reshape(1, 1).astype(jnp.float32)

    m12_np, sel_b_np, sel_m_np, lane_valid_np = _build_constants(
        tb, size, io_dim, out_lanes, fw)
    w4 = params["w4"].reshape(()).astype(jnp.float32)
    b4 = params["b4"].reshape(()).astype(jnp.float32)
    m12 = jnp.asarray(m12_np)
    sel_b = jnp.asarray(sel_b_np)
    sel_m = jnp.asarray(sel_m_np) * w4                  # fold Conv2d(1,1,1) weight
    padb = jnp.where(jnp.asarray(lane_valid_np), b4, jnp.float32(-1e30))
    padb = padb.reshape(1, out_lanes).astype(jnp.float32)

    kernel = functools.partial(_fused_cnn_kernel, fw=fw, npos=npos, tb=tb,
                               out_lanes=out_lanes)

    def resident(shape):
        # Weights / constants: same block every grid step -> stay VMEM-resident.
        return pl.BlockSpec(shape, lambda i: (0, 0))

    out = pl.pallas_call(
        kernel,
        out_shape=jax.ShapeDtypeStruct((nb, tb, out_lanes), jnp.float32),
        grid=(nb,),
        in_specs=[
            pl.BlockSpec((npos, x1.shape[1]), lambda i: (i, 0)),   # per-tile im2col
            resident(w1f.shape), resident(b1.shape),
            resident(w2f.shape), resident(b2.shape),
            resident(w3v.shape), resident(b3.shape),
            resident(m12.shape), resident(sel_b.shape),
            resident(sel_m.shape), resident(padb.shape),
        ],
        out_specs=pl.BlockSpec((1, tb, out_lanes), lambda i: (i, 0, 0)),
        scratch_shapes=[
            pltpu.VMEM((nrows, h0), jnp.float32),        # f2: re-padded layer-2 frame
            pltpu.VMEM((nrows, h1), jnp.float32),        # f3: layer-3 input frame
            pltpu.VMEM((npos, 9 * h0), jnp.bfloat16),    # layer-2 im2col slab
        ],
        compiler_params=pltpu.CompilerParams(
            dimension_semantics=("parallel",)),
    )(x1, w1f, b1, w2f, b2, w3v, b3, m12, sel_b, sel_m, padb)

    return out.reshape(B, out_lanes)[:, :io_dim]


# ---------------------------------------------------------------------------
# Pure-JAX reference (mirrors the PyTorch module) for validation
# ---------------------------------------------------------------------------
def reference_forward(x, params, io_dim):
    dn = ("NCHW", "OIHW", "NCHW")

    def conv(x, w, b, pad):
        y = lax.conv_general_dilated(
            x, w, window_strides=(1, 1), padding=[(pad, pad), (pad, pad)],
            dimension_numbers=dn, precision=lax.Precision.HIGHEST)
        return y + b.reshape(1, -1, 1, 1)

    y = jax.nn.relu(conv(x, params["w1"], params["b1"], 2))
    y = jax.nn.relu(conv(y, params["w2"], params["b2"], 1))
    y = jax.nn.relu(conv(y, params["w3"], params["b3"], 0))
    y = conv(y, params["w4"], params["b4"], 0)
    return jax.nn.softmax(y.reshape(-1, io_dim), axis=1)


# ---------------------------------------------------------------------------
# Parameters (deterministic, PyTorch Conv2d default init shapes/scales)
# ---------------------------------------------------------------------------
def _conv_init(key, cout, cin, k):
    fan_in = cin * k * k
    bound = fan_in ** -0.5
    kw, kb = jax.random.split(key)
    w = jax.random.uniform(kw, (cout, cin, k, k), minval=-bound, maxval=bound,
                           dtype=jnp.float32)
    b = jax.random.uniform(kb, (cout,), minval=-bound, maxval=bound,
                           dtype=jnp.float32)
    return w, b


def init_params(key, hidden=(32, 32)):
    k1, k2, k3, k4 = jax.random.split(key, 4)
    p = {}
    p["w1"], p["b1"] = _conv_init(k1, hidden[0], 9, 3)          # Conv2d(9, h0, 3)
    p["w2"], p["b2"] = _conv_init(k2, hidden[1], hidden[0], 3)  # Conv2d(h0, h1, 3)
    p["w3"], p["b3"] = _conv_init(k3, 1, hidden[-1], 3)         # Conv2d(h1, 1, 3)
    p["w4"], p["b4"] = _conv_init(k4, 1, 1, 1)                  # Conv2d(1, 1, 1)
    return p


if __name__ == "__main__":
    size = 4                 # Hex board size -> io_dim = 16
    io_dim = size * size
    batch = 2

    key = jax.random.PRNGKey(0)
    kp, kx = jax.random.split(key)
    params = init_params(kp, hidden=(32, 32))

    # TODO(synk): transform_input (Hex bridge-plane featurization) is host-side
    # game logic with no Pallas equivalent; we feed pre-built 9-plane inputs.
    x = (jax.random.uniform(kx, (batch, 9, size, size)) > 0.5).astype(jnp.float32)

    fwd = jax.jit(cnn_forward, static_argnames=("io_dim", "batch_tile"))
    out = fwd(x, params, io_dim=io_dim, batch_tile=1)
    out = jax.block_until_ready(out)

    assert out.shape == (batch, io_dim)
    # softmax rows sum to 1 (approx reciprocal on the EUP -> relax to 2e-3)
    assert bool(jnp.allclose(jnp.sum(out, axis=1), 1.0, atol=2e-3))

    # match the pure-JAX/XLA reference of the PyTorch forward
    ref = reference_forward(x, params, io_dim)
    err = float(jnp.max(jnp.abs(out - ref)))
    assert err < 5e-3, f"max abs diff vs reference: {err}"

    print("KERNEL_OK")
</pallas_src>

<mosaic_0001>
module attributes {stable_mosaic.version = 11 : i64} {
  func.func @_fused_cnn_kernel(%arg0: i32, %arg1: memref<64x81xbf16, #tpu.memory_space<vmem>>, %arg2: memref<81x32xbf16, #tpu.memory_space<vmem>>, %arg3: memref<1x32xf32, #tpu.memory_space<vmem>>, %arg4: memref<288x32xbf16, #tpu.memory_space<vmem>>, %arg5: memref<1x32xf32, #tpu.memory_space<vmem>>, %arg6: memref<9x32xf32, #tpu.memory_space<vmem>>, %arg7: memref<1x1xf32, #tpu.memory_space<vmem>>, %arg8: memref<64x1xf32, #tpu.memory_space<vmem>>, %arg9: memref<1x64xf32, #tpu.memory_space<vmem>>, %arg10: memref<64x128xf32, #tpu.memory_space<vmem>>, %arg11: memref<1x128xf32, #tpu.memory_space<vmem>>, %arg12: memref<1x1x128xf32, #tpu.memory_space<vmem>>, %arg13: memref<88x32xf32, #tpu.memory_space<vmem>>, %arg14: memref<88x32xf32, #tpu.memory_space<vmem>>, %arg15: memref<64x288xbf16, #tpu.memory_space<vmem>>) attributes {dimension_semantics = [#tpu.dimension_semantics<parallel>], iteration_bounds = array<i64: 2>, scalar_prefetch = 0 : i64, scratch_operands = 3 : i64, tpu.core_type = #tpu.core_type<tc>, window_params = [{transform_indices = @transform_0, window_bounds = array<i64: 64, 81>}, {pipeline_mode = #tpu.pipeline_mode<synchronous>, transform_indices = @transform_1, window_bounds = array<i64: 81, 32>}, {pipeline_mode = #tpu.pipeline_mode<synchronous>, transform_indices = @transform_2, window_bounds = array<i64: 1, 32>}, {pipeline_mode = #tpu.pipeline_mode<synchronous>, transform_indices = @transform_3, window_bounds = array<i64: 288, 32>}, {pipeline_mode = #tpu.pipeline_mode<synchronous>, transform_indices = @transform_4, window_bounds = array<i64: 1, 32>}, {pipeline_mode = #tpu.pipeline_mode<synchronous>, transform_indices = @transform_5, window_bounds = array<i64: 9, 32>}, {pipeline_mode = #tpu.pipeline_mode<synchronous>, transform_indices = @transform_6, window_bounds = array<i64: 1, 1>}, {pipeline_mode = #tpu.pipeline_mode<synchronous>, transform_indices = @transform_7, window_bounds = array<i64: 64, 1>}, {pipeline_mode = #tpu.pipeline_mode<synchronous>, transform_indices = @transform_8, window_bounds = array<i64: 1, 64>}, {pipeline_mode = #tpu.pipeline_mode<synchronous>, transform_indices = @transform_9, window_bounds = array<i64: 64, 128>}, {pipeline_mode = #tpu.pipeline_mode<synchronous>, transform_indices = @transform_10, window_bounds = array<i64: 1, 128>}, {transform_indices = @transform_11, window_bounds = array<i64: 1, 1, 128>}]} {
    %c0 = arith.constant 0 : index
    %c0_0 = arith.constant 0 : index
    %0 = vector.load %arg1[%c0, %c0_0] : memref<64x81xbf16, #tpu.memory_space<vmem>>, vector<64x81xbf16>
    %c0_1 = arith.constant 0 : index
    %c0_2 = arith.constant 0 : index
    %1 = vector.load %arg2[%c0_1, %c0_2] : memref<81x32xbf16, #tpu.memory_space<vmem>>, vector<81x32xbf16>
    %cst = arith.constant dense<0.000000e+00> : vector<64x32xf32>
    %2 = tpu.matmul %0, %1, %cst {dimension_numbers = #tpu.dot_dimension_numbers<[1], [0], [0], [1], [0, 0, 1, 1], [], []>} : vector<64x81xbf16>, vector<81x32xbf16>, vector<64x32xf32> -> vector<64x32xf32>
    %c0_3 = arith.constant 0 : index
    %c0_4 = arith.constant 0 : index
    %3 = vector.load %arg3[%c0_3, %c0_4] : memref<1x32xf32, #tpu.memory_space<vmem>>, vector<1x32xf32>
    %4 = vector.broadcast %3 : vector<1x32xf32> to vector<64x32xf32>
    %5 = arith.addf %2, %4 : vector<64x32xf32>
    %cst_5 = arith.constant 0.000000e+00 : f32
    %6 = vector.broadcast %cst_5 : f32 to vector<64x32xf32>
    %7 = arith.maximumf %5, %6 : vector<64x32xf32>
    %cst_6 = arith.constant 0.000000e+00 : f32
    %8 = vector.broadcast %cst_6 : f32 to vector<9x32xf32>
    %c0_7 = arith.constant 0 : index
    %c0_8 = arith.constant 0 : index
    %9 = vector.load %arg13[%c0_7, %c0_8] : memref<88x32xf32, #tpu.memory_space<vmem>>, vector<9x32xf32>
    tpu.vector_store %arg13[%c0_7, %c0_8], %8 {strides = array<i32>} : memref<88x32xf32, #tpu.memory_space<vmem>>, vector<9x32xf32>,
    %c0_9 = arith.constant 0 : index
    %c0_10 = arith.constant 0 : index
    %10 = vector.load %arg8[%c0_9, %c0_10] : memref<64x1xf32, #tpu.memory_space<vmem>>, vector<64x1xf32>
    %11 = vector.broadcast %10 : vector<64x1xf32> to vector<64x32xf32>
    %12 = arith.mulf %7, %11 : vector<64x32xf32>
    %c9 = arith.constant 9 : index
    %c0_11 = arith.constant 0 : index
    %13 = vector.load %arg13[%c9, %c0_11] : memref<88x32xf32, #tpu.memory_space<vmem>>, vector<64x32xf32>
    tpu.vector_store %arg13[%c9, %c0_11], %12 {strides = array<i32>} : memref<88x32xf32, #tpu.memory_space<vmem>>, vector<64x32xf32>,
    %cst_12 = arith.constant 0.000000e+00 : f32
    %14 = vector.broadcast %cst_12 : f32 to vector<15x32xf32>
    %c73 = arith.constant 73 : index
    %c0_13 = arith.constant 0 : index
    %15 = vector.load %arg13[%c73, %c0_13] : memref<88x32xf32, #tpu.memory_space<vmem>>, vector<15x32xf32>
    tpu.vector_store %arg13[%c73, %c0_13], %14 {strides = array<i32>} : memref<88x32xf32, #tpu.memory_space<vmem>>, vector<15x32xf32>,
    %c0_14 = arith.constant 0 : index
    %c0_15 = arith.constant 0 : index
    %16 = vector.load %arg13[%c0_14, %c0_15] : memref<88x32xf32, #tpu.memory_space<vmem>>, vector<64x32xf32>
    %17 = arith.truncf %16 : vector<64x32xf32> to vector<64x32xbf16>
    %c0_16 = arith.constant 0 : index
    %c0_17 = arith.constant 0 : index
    %18 = vector.load %arg15[%c0_16, %c0_17] : memref<64x288xbf16, #tpu.memory_space<vmem>>, vector<64x32xbf16>
    tpu.vector_store %arg15[%c0_16, %c0_17], %17 {strides = array<i32>} : memref<64x288xbf16, #tpu.memory_space<vmem>>, vector<64x32xbf16>,
    %c1 = arith.constant 1 : index
    %c0_18 = arith.constant 0 : index
    %19 = vector.load %arg13[%c1, %c0_18] : memref<88x32xf32, #tpu.memory_space<vmem>>, vector<64x32xf32>
    %20 = arith.truncf %19 : vector<64x32xf32> to vector<64x32xbf16>
    %c0_19 = arith.constant 0 : index
    %c32 = arith.constant 32 : index
    %21 = vector.load %arg15[%c0_19, %c32] : memref<64x288xbf16, #tpu.memory_space<vmem>>, vector<64x32xbf16>
    tpu.vector_store %arg15[%c0_19, %c32], %20 {strides = array<i32>} : memref<64x288xbf16, #tpu.memory_space<vmem>>, vector<64x32xbf16>,
    %c2 = arith.constant 2 : index
    %c0_20 = arith.constant 0 : index
    %22 = vector.load %arg13[%c2, %c0_20] : memref<88x32xf32, #tpu.memory_space<vmem>>, vector<64x32xf32>
    %23 = arith.truncf %22 : vector<64x32xf32> to vector<64x32xbf16>
    %c0_21 = arith.constant 0 : index
    %c64 = arith.constant 64 : index
    %24 = vector.load %arg15[%c0_21, %c64] : memref<64x288xbf16, #tpu.memory_space<vmem>>, vector<64x32xbf16>
    tpu.vector_store %arg15[%c0_21, %c64], %23 {strides = array<i32>} : memref<64x288xbf16, #tpu.memory_space<vmem>>, vector<64x32xbf16>,
    %c8 = arith.constant 8 : index
    %c0_22 = arith.constant 0 : index
    %25 = vector.load %arg13[%c8, %c0_22] : memref<88x32xf32, #tpu.memory_space<vmem>>, vector<64x32xf32>
    %26 = arith.truncf %25 : vector<64x32xf32> to vector<64x32xbf16>
    %c0_23 = arith.constant 0 : index
    %c96 = arith.constant 96 : index
    %27 = vector.load %arg15[%c0_23, %c96] : memref<64x288xbf16, #tpu.memory_space<vmem>>, vector<64x32xbf16>
    tpu.vector_store %arg15[%c0_23, %c96], %26 {strides = array<i32>} : memref<64x288xbf16, #tpu.memory_space<vmem>>, vector<64x32xbf16>,
    %c9_24 = arith.constant 9 : index
    %c0_25 = arith.constant 0 : index
    %28 = vector.load %arg13[%c9_24, %c0_25] : memref<88x32xf32, #tpu.memory_space<vmem>>, vector<64x32xf32>
    %29 = arith.truncf %28 : vector<64x32xf32> to vector<64x32xbf16>
    %c0_26 = arith.constant 0 : index
    %c128 = arith.constant 128 : index
    %30 = vector.load %arg15[%c0_26, %c128] : memref<64x288xbf16, #tpu.memory_space<vmem>>, vector<64x32xbf16>
    tpu.vector_store %arg15[%c0_26, %c128], %29 {strides = array<i32>} : memref<64x288xbf16, #tpu.memory_space<vmem>>, vector<64x32xbf16>,
    %c10 = arith.constant 10 : index
    %c0_27 = arith.constant 0 : index
    %31 = vector.load %arg13[%c10, %c0_27] : memref<88x32xf32, #tpu.memory_space<vmem>>, vector<64x32xf32>
    %32 = arith.truncf %31 : vector<64x32xf32> to vector<64x32xbf16>
    %c0_28 = arith.constant 0 : index
    %c160 = arith.constant 160 : index
    %33 = vector.load %arg15[%c0_28, %c160] : memref<64x288xbf16, #tpu.memory_space<vmem>>, vector<64x32xbf16>
    tpu.vector_store %arg15[%c0_28, %c160], %32 {strides = array<i32>} : memref<64x288xbf16, #tpu.memory_space<vmem>>, vector<64x32xbf16>,
    %c16 = arith.constant 16 : index
    %c0_29 = arith.constant 0 : index
    %34 = vector.load %arg13[%c16, %c0_29] : memref<88x32xf32, #tpu.memory_space<vmem>>, vector<64x32xf32>
    %35 = arith.truncf %34 : vector<64x32xf32> to vector<64x32xbf16>
    %c0_30 = arith.constant 0 : index
    %c192 = arith.constant 192 : index
    %36 = vector.load %arg15[%c0_30, %c192] : memref<64x288xbf16, #tpu.memory_space<vmem>>, vector<64x32xbf16>
    tpu.vector_store %arg15[%c0_30, %c192], %35 {strides = array<i32>} : memref<64x288xbf16, #tpu.memory_space<vmem>>, vector<64x32xbf16>,
    %c17 = arith.constant 17 : index
    %c0_31 = arith.constant 0 : index
    %37 = vector.load %arg13[%c17, %c0_31] : memref<88x32xf32, #tpu.memory_space<vmem>>, vector<64x32xf32>
    %38 = arith.truncf %37 : vector<64x32xf32> to vector<64x32xbf16>
    %c0_32 = arith.constant 0 : index
    %c224 = arith.constant 224 : index
    %39 = vector.load %arg15[%c0_32, %c224] : memref<64x288xbf16, #tpu.memory_space<vmem>>, vector<64x32xbf16>
    tpu.vector_store %arg15[%c0_32, %c224], %38 {strides = array<i32>} : memref<64x288xbf16, #tpu.memory_space<vmem>>, vector<64x32xbf16>,
    %c18 = arith.constant 18 : index
    %c0_33 = arith.constant 0 : index
    %40 = vector.load %arg13[%c18, %c0_33] : memref<88x32xf32, #tpu.memory_space<vmem>>, vector<64x32xf32>
    %41 = arith.truncf %40 : vector<64x32xf32> to vector<64x32xbf16>
    %c0_34 = arith.constant 0 : index
    %c256 = arith.constant 256 : index
    %42 = vector.load %arg15[%c0_34, %c256] : memref<64x288xbf16, #tpu.memory_space<vmem>>, vector<64x32xbf16>
    tpu.vector_store %arg15[%c0_34, %c256], %41 {strides = array<i32>} : memref<64x288xbf16, #tpu.memory_space<vmem>>, vector<64x32xbf16>,
    %c0_35 = arith.constant 0 : index
    %c0_36 = arith.constant 0 : index
    %43 = vector.load %arg15[%c0_35, %c0_36] : memref<64x288xbf16, #tpu.memory_space<vmem>>, vector<64x288xbf16>
    %c0_37 = arith.constant 0 : index
    %c0_38 = arith.constant 0 : index
    %44 = vector.load %arg4[%c0_37, %c0_38] : memref<288x32xbf16, #tpu.memory_space<vmem>>, vector<288x32xbf16>
    %cst_39 = arith.constant dense<0.000000e+00> : vector<64x32xf32>
    %45 = tpu.matmul %43, %44, %cst_39 {dimension_numbers = #tpu.dot_dimension_numbers<[1], [0], [0], [1], [0, 0, 1, 1], [], []>} : vector<64x288xbf16>, vector<288x32xbf16>, vector<64x32xf32> -> vector<64x32xf32>
    %c0_40 = arith.constant 0 : index
    %c0_41 = arith.constant 0 : index
    %46 = vector.load %arg5[%c0_40, %c0_41] : memref<1x32xf32, #tpu.memory_space<vmem>>, vector<1x32xf32>
    %47 = vector.broadcast %46 : vector<1x32xf32> to vector<64x32xf32>
    %48 = arith.addf %45, %47 : vector<64x32xf32>
    %cst_42 = arith.constant 0.000000e+00 : f32
    %49 = vector.broadcast %cst_42 : f32 to vector<64x32xf32>
    %50 = arith.maximumf %48, %49 : vector<64x32xf32>
    %c0_43 = arith.constant 0 : index
    %c0_44 = arith.constant 0 : index
    %51 = vector.load %arg14[%c0_43, %c0_44] : memref<88x32xf32, #tpu.memory_space<vmem>>, vector<64x32xf32>
    tpu.vector_store %arg14[%c0_43, %c0_44], %50 {strides = array<i32>} : memref<88x32xf32, #tpu.memory_space<vmem>>, vector<64x32xf32>,
    %cst_45 = arith.constant 0.000000e+00 : f32
    %52 = vector.broadcast %cst_45 : f32 to vector<24x32xf32>
    %c64_46 = arith.constant 64 : index
    %c0_47 = arith.constant 0 : index
    %53 = vector.load %arg14[%c64_46, %c0_47] : memref<88x32xf32, #tpu.memory_space<vmem>>, vector<24x32xf32>
    tpu.vector_store %arg14[%c64_46, %c0_47], %52 {strides = array<i32>} : memref<88x32xf32, #tpu.memory_space<vmem>>, vector<24x32xf32>,
    %c0_48 = arith.constant 0 : index
    %c0_49 = arith.constant 0 : index
    %54 = vector.load %arg6[%c0_48, %c0_49] : memref<9x32xf32, #tpu.memory_space<vmem>>, vector<9x32xf32>
    %c0_50 = arith.constant 0 : index
    %c0_51 = arith.constant 0 : index
    %55 = vector.load %arg14[%c0_50, %c0_51] : memref<88x32xf32, #tpu.memory_space<vmem>>, vector<64x32xf32>
    %56 = vector.extract_strided_slice %54 {offsets = [0, 0], sizes = [1, 32], strides = [1, 1]} : vector<9x32xf32> to vector<1x32xf32>
    %57 = vector.broadcast %56 : vector<1x32xf32> to vector<64x32xf32>
    %58 = arith.mulf %55, %57 : vector<64x32xf32>
    %c1_52 = arith.constant 1 : index
    %c0_53 = arith.constant 0 : index
    %59 = vector.load %arg14[%c1_52, %c0_53] : memref<88x32xf32, #tpu.memory_space<vmem>>, vector<64x32xf32>
    %60 = vector.extract_strided_slice %54 {offsets = [1, 0], sizes = [1, 32], strides = [1, 1]} : vector<9x32xf32> to vector<1x32xf32>
    %61 = vector.broadcast %60 : vector<1x32xf32> to vector<64x32xf32>
    %62 = arith.mulf %59, %61 : vector<64x32xf32>
    %63 = arith.addf %58, %62 : vector<64x32xf32>
    %c2_54 = arith.constant 2 : index
    %c0_55 = arith.constant 0 : index
    %64 = vector.load %arg14[%c2_54, %c0_55] : memref<88x32xf32, #tpu.memory_space<vmem>>, vector<64x32xf32>
    %65 = vector.extract_strided_slice %54 {offsets = [2, 0], sizes = [1, 32], strides = [1, 1]} : vector<9x32xf32> to vector<1x32xf32>
    %66 = vector.broadcast %65 : vector<1x32xf32> to vector<64x32xf32>
    %67 = arith.mulf %64, %66 : vector<64x32xf32>
    %68 = arith.addf %63, %67 : vector<64x32xf32>
    %c8_56 = arith.constant 8 : index
    %c0_57 = arith.constant 0 : index
    %69 = vector.load %arg14[%c8_56, %c0_57] : memref<88x32xf32, #tpu.memory_space<vmem>>, vector<64x32xf32>
    %70 = vector.extract_strided_slice %54 {offsets = [3, 0], sizes = [1, 32], strides = [1, 1]} : vector<9x32xf32> to vector<1x32xf32>
    %71 = vector.broadcast %70 : vector<1x32xf32> to vector<64x32xf32>
    %72 = arith.mulf %69, %71 : vector<64x32xf32>
    %73 = arith.addf %68, %72 : vector<64x32xf32>
    %c9_58 = arith.constant 9 : index
    %c0_59 = arith.constant 0 : index
    %74 = vector.load %arg14[%c9_58, %c0_59] : memref<88x32xf32, #tpu.memory_space<vmem>>, vector<64x32xf32>
    %75 = vector.extract_strided_slice %54 {offsets = [4, 0], sizes = [1, 32], strides = [1, 1]} : vector<9x32xf32> to vector<1x32xf32>
    %76 = vector.broadcast %75 : vector<1x32xf32> to vector<64x32xf32>
    %77 = arith.mulf %74, %76 : vector<64x32xf32>
    %78 = arith.addf %73, %77 : vector<64x32xf32>
    %c10_60 = arith.constant 10 : index
    %c0_61 = arith.constant 0 : index
    %79 = vector.load %arg14[%c10_60, %c0_61] : memref<88x32xf32, #tpu.memory_space<vmem>>, vector<64x32xf32>
    %80 = vector.extract_strided_slice %54 {offsets = [5, 0], sizes = [1, 32], strides = [1, 1]} : vector<9x32xf32> to vector<1x32xf32>
    %81 = vector.broadcast %80 : vector<1x32xf32> to vector<64x32xf32>
    %82 = arith.mulf %79, %81 : vector<64x32xf32>
    %83 = arith.addf %78, %82 : vector<64x32xf32>
    %c16_62 = arith.constant 16 : index
    %c0_63 = arith.constant 0 : index
    %84 = vector.load %arg14[%c16_62, %c0_63] : memref<88x32xf32, #tpu.memory_space<vmem>>, vector<64x32xf32>
    %85 = vector.extract_strided_slice %54 {offsets = [6, 0], sizes = [1, 32], strides = [1, 1]} : vector<9x32xf32> to vector<1x32xf32>
    %86 = vector.broadcast %85 : vector<1x32xf32> to vector<64x32xf32>
    %87 = arith.mulf %84, %86 : vector<64x32xf32>
    %88 = arith.addf %83, %87 : vector<64x32xf32>
    %c17_64 = arith.constant 17 : index
    %c0_65 = arith.constant 0 : index
    %89 = vector.load %arg14[%c17_64, %c0_65] : memref<88x32xf32, #tpu.memory_space<vmem>>, vector<64x32xf32>
    %90 = vector.extract_strided_slice %54 {offsets = [7, 0], sizes = [1, 32], strides = [1, 1]} : vector<9x32xf32> to vector<1x32xf32>
    %91 = vector.broadcast %90 : vector<1x32xf32> to vector<64x32xf32>
    %92 = arith.mulf %89, %91 : vector<64x32xf32>
    %93 = arith.addf %88, %92 : vector<64x32xf32>
    %c18_66 = arith.constant 18 : index
    %c0_67 = arith.constant 0 : index
    %94 = vector.load %arg14[%c18_66, %c0_67] : memref<88x32xf32, #tpu.memory_space<vmem>>, vector<64x32xf32>
    %95 = vector.extract_strided_slice %54 {offsets = [8, 0], sizes = [1, 32], strides = [1, 1]} : vector<9x32xf32> to vector<1x32xf32>
    %96 = vector.broadcast %95 : vector<1x32xf32> to vector<64x32xf32>
    %97 = arith.mulf %94, %96 : vector<64x32xf32>
    %98 = arith.addf %93, %97 : vector<64x32xf32>
    %cst_68 = arith.constant dense<0.000000e+00> : vector<64xf32>
    %99 = vector.multi_reduction <add>, %98, %cst_68 [1] : vector<64x32xf32> to vector<64xf32>
    %100 = vector.shape_cast %99 : vector<64xf32> to vector<64x1xf32>
    %c0_69 = arith.constant 0 : index
    %c0_70 = arith.constant 0 : index
    %101 = vector.load %arg7[%c0_69, %c0_70] : memref<1x1xf32, #tpu.memory_space<vmem>>, vector<1x1xf32>
    %102 = vector.broadcast %101 : vector<1x1xf32> to vector<64x1xf32>
    %103 = arith.addf %100, %102 : vector<64x1xf32>
    %cst_71 = arith.constant 0.000000e+00 : f32
    %104 = vector.broadcast %cst_71 : f32 to vector<64x1xf32>
    %105 = arith.maximumf %103, %104 : vector<64x1xf32>
    %c0_72 = arith.constant 0 : index
    %c0_73 = arith.constant 0 : index
    %106 = vector.load %arg10[%c0_72, %c0_73] : memref<64x128xf32, #tpu.memory_space<vmem>>, vector<64x128xf32>
    %107 = vector.broadcast %105 : vector<64x1xf32> to vector<64x128xf32>
    %108 = arith.mulf %107, %106 : vector<64x128xf32>
    %c0_74 = arith.constant 0 : index
    %c0_75 = arith.constant 0 : index
    %109 = vector.load %arg9[%c0_74, %c0_75] : memref<1x64xf32, #tpu.memory_space<vmem>>, vector<1x64xf32>
    %cst_76 = arith.constant dense<0.000000e+00> : vector<1x128xf32>
    %110 = tpu.matmul %109, %108, %cst_76 {dimension_numbers = #tpu.dot_dimension_numbers<[1], [0], [0], [1], [0, 0, 1, 1], [], []>} : vector<1x64xf32>, vector<64x128xf32>, vector<1x128xf32> -> vector<1x128xf32>
    %c0_77 = arith.constant 0 : index
    %c0_78 = arith.constant 0 : index
    %111 = vector.load %arg11[%c0_77, %c0_78] : memref<1x128xf32, #tpu.memory_space<vmem>>, vector<1x128xf32>
    %112 = arith.addf %110, %111 : vector<1x128xf32>
    %cst_79 = arith.constant dense<0xFF800000> : vector<1xf32>
    %113 = vector.multi_reduction <maximumf>, %112, %cst_79 [1] : vector<1x128xf32> to vector<1xf32>
    %114 = vector.shape_cast %113 : vector<1xf32> to vector<1x1xf32>
    %115 = vector.broadcast %114 : vector<1x1xf32> to vector<1x128xf32>
    %116 = arith.subf %112, %115 : vector<1x128xf32>
    %117 = math.exp %116 : vector<1x128xf32>
    %cst_80 = arith.constant dense<0.000000e+00> : vector<1xf32>
    %118 = vector.multi_reduction <add>, %117, %cst_80 [1] : vector<1x128xf32> to vector<1xf32>
    %119 = vector.shape_cast %118 : vector<1xf32> to vector<1x1xf32>
    %120 = tpu.reciprocal %119 {approx = true} : vector<1x1xf32> -> vector<1x1xf32>
    %121 = vector.broadcast %120 : vector<1x1xf32> to vector<1x128xf32>
    %122 = arith.mulf %117, %121 : vector<1x128xf32>
    %123 = vector.shape_cast %122 : vector<1x128xf32> to vector<1x1x128xf32>
    %c0_81 = arith.constant 0 : index
    %c0_82 = arith.constant 0 : index
    %c0_83 = arith.constant 0 : index
    %124 = vector.load %arg12[%c0_81, %c0_82, %c0_83] : memref<1x1x128xf32, #tpu.memory_space<vmem>>, vector<1x1x128xf32>
    tpu.vector_store %arg12[%c0_81, %c0_82, %c0_83], %123 {strides = array<i32>} : memref<1x1x128xf32, #tpu.memory_space<vmem>>, vector<1x1x128xf32>,
    return
  }
  func.func @transform_0(%arg0: i32) -> (i32, i32) {
    %c0_i32 = arith.constant 0 : i32
    %c0_i32_0 = arith.constant 0 : i32
    return %arg0, %c0_i32 : i32, i32
  }
  func.func @transform_1(%arg0: i32) -> (i32, i32) {
    %c0_i32 = arith.constant 0 : i32
    %c0_i32_0 = arith.constant 0 : i32
    %c0_i32_1 = arith.constant 0 : i32
    return %c0_i32, %c0_i32_0 : i32, i32
  }
  func.func @transform_2(%arg0: i32) -> (i32, i32) {
    %c0_i32 = arith.constant 0 : i32
    %c0_i32_0 = arith.constant 0 : i32
    %c0_i32_1 = arith.constant 0 : i32
    return %c0_i32, %c0_i32_0 : i32, i32
  }
  func.func @transform_3(%arg0: i32) -> (i32, i32) {
    %c0_i32 = arith.constant 0 : i32
    %c0_i32_0 = arith.constant 0 : i32
    %c0_i32_1 = arith.constant 0 : i32
    return %c0_i32, %c0_i32_0 : i32, i32
  }
  func.func @transform_4(%arg0: i32) -> (i32, i32) {
    %c0_i32 = arith.constant 0 : i32
    %c0_i32_0 = arith.constant 0 : i32
    %c0_i32_1 = arith.constant 0 : i32
    return %c0_i32, %c0_i32_0 : i32, i32
  }
  func.func @transform_5(%arg0: i32) -> (i32, i32) {
    %c0_i32 = arith.constant 0 : i32
    %c0_i32_0 = arith.constant 0 : i32
    %c0_i32_1 = arith.constant 0 : i32
    return %c0_i32, %c0_i32_0 : i32, i32
  }
  func.func @transform_6(%arg0: i32) -> (i32, i32) {
    %c0_i32 = arith.constant 0 : i32
    %c0_i32_0 = arith.constant 0 : i32
    %c0_i32_1 = arith.constant 0 : i32
    return %c0_i32, %c0_i32_0 : i32, i32
  }
  func.func @transform_7(%arg0: i32) -> (i32, i32) {
    %c0_i32 = arith.constant 0 : i32
    %c0_i32_0 = arith.constant 0 : i32
    %c0_i32_1 = arith.constant 0 : i32
    return %c0_i32, %c0_i32_0 : i32, i32
  }
  func.func @transform_8(%arg0: i32) -> (i32, i32) {
    %c0_i32 = arith.constant 0 : i32
    %c0_i32_0 = arith.constant 0 : i32
    %c0_i32_1 = arith.constant 0 : i32
    return %c0_i32, %c0_i32_0 : i32, i32
  }
  func.func @transform_9(%arg0: i32) -> (i32, i32) {
    %c0_i32 = arith.constant 0 : i32
    %c0_i32_0 = arith.constant 0 : i32
    %c0_i32_1 = arith.constant 0 : i32
    return %c0_i32, %c0_i32_0 : i32, i32
  }
  func.func @transform_10(%arg0: i32) -> (i32, i32) {
    %c0_i32 = arith.constant 0 : i32
    %c0_i32_0 = arith.constant 0 : i32
    %c0_i32_1 = arith.constant 0 : i32
    return %c0_i32, %c0_i32_0 : i32, i32
  }
  func.func @transform_11(%arg0: i32) -> (i32, i32, i32) {
    %c0_i32 = arith.constant 0 : i32
    %c0_i32_0 = arith.constant 0 : i32
    %c0_i32_1 = arith.constant 0 : i32
    return %arg0, %c0_i32, %c0_i32_0 : i32, i32, i32
  }
}

</mosaic_0001>

<bundles_post_ra>
// kernel: cnn_forward.1
= control target key start
LH: loop header
LB: loop body
LE: loop exit
PB: predicated region body
PF: predicated region fallthrough
CT: control target
= control target key end

     0   :  { %s2527_s0 = inlined_call_operand.vmem [shape: bf16[128,81], index: 0, kind: input, shape index: {}]   ;;  %s2528_s1 = inlined_call_operand.vmem [shape: bf16[81,32], index: 1, kind: input, shape index: {}]   ;;  %s2529_s2 = inlined_call_operand.vmem [shape: f32[1,32], index: 2, kind: input, shape index: {}]   ;;  %s2530_s3 = inlined_call_operand.vmem [shape: bf16[288,32], index: 3, kind: input, shape index: {}]   ;;  %s2531_s4 = inlined_call_operand.vmem [shape: f32[1,32], index: 4, kind: input, shape index: {}]   ;;  %s2532_s5 = inlined_call_operand.vmem [shape: f32[9,32], index: 5, kind: input, shape index: {}]   ;;  %s2533_s6 = inlined_call_operand.<no memory space> [shape: f32[1,1], index: 6, kind: input, shape index: {}]   ;;  %s2534_s7 = inlined_call_operand.vmem [shape: f32[64,1], index: 7, kind: input, shape index: {}]   ;;  %s2535_s8 = inlined_call_operand.vmem [shape: f32[1,64], index: 8, kind: input, shape index: {}]   ;;  %s2536_s9 = inlined_call_operand.vmem [shape: f32[64,128], index: 9, kind: input, shape index: {}]   ;;  %s2537_s10 = inlined_call_operand.vmem [shape: f32[1,128], index: 10, kind: input, shape index: {}]   ;;  %s2538_s11 = inlined_call_operand.hbm [shape: f32[2,1,128], index: 11, kind: output, shape index: {}]  }
   0x1   :  { %v16_v0 = vstv %s2533_s6 }
   0x2   :  { %17 = vst [vmem:[#allocation5] sm:$0x1] %v16_v0 }
   0x3   :  { %18 = vsyncpa [#allocation7], 0 }
   0x4   :  { %20 = vsyncpa [#allocation7 + $0x1], 0  ;;  %s2054_s19 = smov 0   ;;  %s2056_s20 = smov 0  }
   0x5   :  { %s2058_s21 = smov 0   ;;  %s2060_s22 = smov 0  }
   0x6 LB: > { %s2075_s6 = sadd.s32 4294967295, %s1981_s22   ;;  %s1661_s23 = sadd.s32 4294967294, %s1981_s22   ;;  %s1981_s22 = sphi %s2060_s22, %s2546_s22   ;;  %s1977_s21 = sphi %s2058_s21, %s2545_s21   ;;  %s1973_s20 = sphi %s2056_s20, %s2544_s20   ;;  %s1969_s19 = sphi %s2054_s19, %s2543_s19  }
   0x7   : > { %s2079_s24 = sadd.s32 1, %s1981_s22   ;;  %s269_s25 = sadd.s32 1, %s1977_s21 }
   0x8   : > { %s266_s26 = ssub.s32 %s1981_s22, %s2079_s24  ;;  %p279_p0 = scmp.ne.s32.totalorder %s1977_s21, %s1973_s20 }
   0x9   : > { %p267_p1 = scmp.eq.s32.totalorder %s266_s26, 0  ;;  %p280_p2 = scmp.eq.s32.totalorder %s2075_s6, 1 }
   0xa   : > { %p285_p3 = scmp.ne.s32.totalorder %s1973_s20, %s1969_s19  ;;  %p286_p4 = scmp.eq.s32.totalorder %s1661_s23, 1 }
   0xb   : > { %s2090_s27 = scalar_select %p267_p1, %s1977_s21, %s269_s25  }
   0xc   : > { %p2092_p5 = por %p280_p2, %p279_p0  ;;  %p2096_p6 = por %p286_p4, %p285_p3 }
   0xd   : > { %2539 = sst [smem:[#allocation9_spill]] %s2090_s27  ;;  %p1664_p7 = scmp.ge.s32.totalorder %s1981_s22, 1 }
   0xe   : > { %p343_p8 = scmp.lt.s32.totalorder %s1981_s22, 3 }
  0x10   : > { %p344_p9 = pnand %p1664_p7, %p343_p8 }
  0x11   : > { %v1887_v1 = vld [vmem:[%s2528_s1] sm:$0xff] (!%p344_p9)   ;;  %v1888_v2 = vld [vmem:[%s2528_s1 + $0x8] sm:$0xff] (!%p344_p9)   ;;  %v1983_v3 = vmov (!%p344_p9), 0   ;;  %s1665_s15 = sshll.u32 (!%p344_p9), %s2075_s6, 3  ;;  %v1889_v4 = vld [vmem:[%s2528_s1 + $0x10] sm:$0xff] (!%p344_p9)   ;;  %vm468_vm0 = vcmask (!%p344_p9), 662528  }
  0x12   : > { %347 = sbr.rel (%p344_p9) target bundleno = 1518 (0x5ee), region = 64  ;;  %1776 = vmatprep.subr.bf16.mxu0 (!%p344_p9), %v1887_v1  ;;  %1885 = vset.pattern.permute.xlu0 (!%p344_p9), %v1983_v3  ;;  %p383_p10 = scmp.lt.s32.totalorder (!%p344_p9), %s1665_s15, 15  ;;  %v564_v5 = vld [vmem:[%s2534_s7] sm:$0xff] (!%p344_p9)  ;;  %v566_v6 = vld [vmem:[%s2534_s7 + $0x10] sm:$0xff] (!%p344_p9)  ;;  %v1890_v7 = vld [vmem:[%s2528_s1 + $0x18] sm:$0xff] (!%p344_p9)   ;;  %vm481_vm1 = vcmask (!%p344_p9), 1040384  }
  0x13   : > { %1777 = vmatpush3.bf16.msra.mxu0 (!%p344_p9), %v1887_v1  ;;  %1886 = vset.pattern.permute.xlu1 (!%p344_p9), %v1983_v3  ;;  %v565_v8 = vld [vmem:[%s2534_s7 + $0x8] sm:$0xff] (!%p344_p9)  ;;  %v567_v9 = vld [vmem:[%s2534_s7 + $0x18] sm:$0xff] (!%p344_p9)  ;;  %v1891_v12 = vld [vmem:[%s2528_s1 + $0x20] sm:$0xff] (!%p344_p9)   ;;  %v483_v14 = vsel (!%p344_p9), %vm481_vm1, 65535, %v1983_v3  ;;  %vm560_vm2 = vcmask (!%p344_p9), 261120   ;;  %vm562_vm3 = vcmask (!%p344_p9), 253952  }
  0x14   : > { %1778 = vmatprep.subr.bf16.mxu0 (!%p344_p9), %v1888_v2  ;;  %574 = vperm.xlu0 (!%p344_p9), %1885, %v564_v5   ;;  %v1892_v10 = vld [vmem:[%s2528_s1 + $0x28] ss:$0 sps:$4 sm:$0x11] (!%p344_p9)   ;;  %v568_v13 = vld [vmem:[%s2534_s7 + $0x20] sm:$0xff] (!%p344_p9)  ;;  %v570_v16 = vld [vmem:[%s2534_s7 + $0x30] sm:$0xff] (!%p344_p9)  ;;  %v1984_v22 = vmov (!%p344_p9), 0.0  }
  0x15   : > { %584 = vperm.xlu1 (!%p344_p9), %1886, %v566_v6   ;;  %v569_v15 = vld [vmem:[%s2534_s7 + $0x28] sm:$0xff] (!%p344_p9)  ;;  %v485_v17 = vand.u32 (!%p344_p9), %v1892_v10, %v483_v14  ;;  %v571_v18 = vld [vmem:[%s2534_s7 + $0x38] sm:$0xff] (!%p344_p9)  ;;  %628 = vst.msk [vmem:[#allocation2 + $0x49] sm:$0xff] (!%p344_p9), %vm560_vm2, %v1984_v22  ;;  %561 = vst.msk [vmem:[#allocation2] sm:$0xff] (!%p344_p9), %vm560_vm2, %v1984_v22  ;;  %vm629_vm4 = vcmask (!%p344_p9), 260096   ;;  %s1985_s27 = smov (!%p344_p9), 32  }
  0x16   : > { %1195 = vst.msk [vmem:[#allocation3 + $0x40] sm:$0xff] (!%p344_p9), %vm560_vm2, %v1984_v22  ;;  %1196 = vst.msk [vmem:[#allocation3 + $0x48] sm:$0xff] (!%p344_p9), %vm560_vm2, %v1984_v22  ;;  %v1897_v23 = vld [vmem:[%s2530_s3 + $0x80] sm:$0xff] (!%p344_p9)   ;;  %v1898_v24 = vld [vmem:[%s2530_s3 + $0x88] sm:$0xff] (!%p344_p9)   ;;  %s1986_s12 = smov (!%p344_p9), 64   ;;  %s1987_s14 = smov (!%p344_p9), 96  }
  0x17   : > { %1779 = vmatpush3.bf16.msra.mxu0 (!%p344_p9), %v1888_v2  ;;  %1197 = vst.msk [vmem:[#allocation3 + $0x50] sm:$0xff] (!%p344_p9), %vm560_vm2, %v1984_v22  ;;  %v1899_v25 = vld [vmem:[%s2530_s3 + $0x40] sm:$0xff] (!%p344_p9)   ;;  %v1901_v27 = vld [vmem:[%s2530_s3 + $0x48] sm:$0xff] (!%p344_p9)   ;;  %v1903_v29 = vld [vmem:[%s2530_s3 + $0x50] sm:$0xff] (!%p344_p9)   ;;  %vm675_vm5 = vcmask (!%p344_p9), 523520   ;;  %vm708_vm6 = vcmask (!%p344_p9), 785920  }
  0x18   : > { %1780 = vmatprep.subr.bf16.mxu0 (!%p344_p9), %v1889_v4  ;;  %579 = vperm.xlu0 (!%p344_p9), %1885, %v565_v8   ;;  %563 = vst.msk [vmem:[#allocation2 + $0x8] sm:$0x1] (!%p344_p9), %vm562_vm3, %v1984_v22  ;;  %v1900_v26 = vld [vmem:[%s2530_s3] sm:$0xff] (!%p344_p9)   ;;  %v1902_v28 = vld [vmem:[%s2530_s3 + $0x8] sm:$0xff] (!%p344_p9)   ;;  %v1904_v30 = vld [vmem:[%s2530_s3 + $0x10] sm:$0xff] (!%p344_p9)   ;;  %vm741_vm7 = vcmask (!%p344_p9), 1048320  }
  0x19   : > { %s2548_s15 = smov (!%p383_p10, %s1665_s15), 15  ;;  %589 = vperm.xlu1 %1886, %v567_v9   ;;  %630 = vst.msk [vmem:[#allocation2 + $0x51] sm:$0x7f] %vm629_vm4, %v1984_v22  ;;  %1721 = vmatprep.subr.bf16.mxu1 %v1899_v25  ;;  %v1905_v31 = vld [vmem:[%s2530_s3 + $0x58] sm:$0xff]   ;;  %v1667_v34 = vld [vmem:[%s2529_s2] ss:$0 sm:$0xff] }
  0x1a   : > { %s1666_s13 = sshll.u32 %s2548_s15, 2  ;;  %1722 = vmatpush3.bf16.msra.mxu1 %v1900_v26  ;;  %v1906_v49 = vld [vmem:[%s2530_s3 + $0x18] sm:$0xff]   ;;  %v1907_v54 = vld [vmem:[%s2530_s3 + $0x60] sm:$0xff]   ;;  %v1909_v2 = vld [vmem:[%s2530_s3 + $0x68] sm:$0xff]   ;;  %vm1989_vm8 = vmmov 0   ;;  %vm1507_vm9 = vcmask 523264  }
  0x1b   : > { %s386_s26 = scalar_lea.vmem %s2527_s0, %s1666_s13  ;;  %1781 = vmatpush3.bf16.msra.mxu0 %v1889_v4  ;;  %1723 = vmatprep.subr.bf16.mxu1 %v1901_v27  ;;  %v1908_v60 = vld [vmem:[%s2530_s3 + $0x20] sm:$0xff]   ;;  %v1910_v10 = vld [vmem:[%s2530_s3 + $0x28] sm:$0xff]   ;;  %s380_s13 = sand.u32 1, %s1973_s20  }
  0x1c   : > { %v1893_v11 = vld [vmem:[%s386_s26] sm:$0xff]   ;;  %1782 = vmatprep.subr.bf16.mxu0 %v1890_v7  ;;  %594 = vperm.xlu0 %1885, %v568_v13   ;;  %v1894_v19 = vld [vmem:[%s386_s26 + $0x8] sm:$0xff]   ;;  %v1895_v20 = vld [vmem:[%s386_s26 + $0x10] sm:$0xff]   ;;  %s1708_s17 = sshll.u32 %s2075_s6, 4  ;;  %s381_s18 = scalar_lea.vmem [#allocation6], %s380_s13 }
  0x1d   : > { %1788 = vmatprep.mubr.msk.bf16.mxu0 %vm468_vm0, %v1893_v11  ;;  %599 = vperm.xlu1 %1886, %v569_v15   ;;  %v1896_v21 = vld [vmem:[%s386_s26 + $0x18] sm:$0xff]   ;;  %v631_v9 = vld [vmem:[#allocation2] sm:$0xff]  ;;  %s1606_s23 = sshll.u32 %s381_s18, 4  ;;  %s2485_s30 = scalar_lea.hbm %s2538_s11, %s1708_s17  ;;  %s2487_s23 = int_to_ptr.vmem [resolvable:$true] %s1606_s23 }
  0x1e   : > { %1724 = vmatpush3.bf16.msra.mxu1 %v1902_v28  ;;  %s1594_s15 = scalar_lea.sflag [#allocation7], %s380_s13  ;;  %s1990_s6 = smov [#allocation6]  }
  0x1f   : > { %1783 = vmatpush3.bf16.msra.mxu0 %v1890_v7  ;;  %1725 = vmatprep.subr.bf16.mxu1 %v1903_v29  ;;  %v647_v8 = vld [vmem:[#allocation2 + $0x1] sm:$0xff] }
  0x20   : > { %1784 = vmatprep.subr.bf16.mxu0 %v1891_v12  ;;  %604 = vperm.xlu0 %1885, %v570_v16  }
  0x21   : > { %609 = vperm.xlu1 %1886, %v571_v18  }
  0x22   : > { %1726 = vmatpush3.bf16.msra.mxu1 %v1904_v30 }
  0x23   : > { %1785 = vmatpush3.bf16.msra.mxu0 %v1891_v12  ;;  %1727 = vmatprep.subr.bf16.mxu1 %v1905_v31 }
  0x24   : > { %1786 = vmatprep.subr.bf16.mxu0 %v485_v17 }
  0x26   : > { %1728 = vmatpush3.bf16.msra.mxu1 %v1906_v49 }
  0x27   : > { %1787 = vmatpush3.bf16.msra.mxu0 %v485_v17  ;;  %1729 = vmatprep.subr.bf16.mxu1 %v1907_v54 }
  0x28   : > { %1796 = vmatprep.subr.bf16.mxu0 %v1897_v23 }
  0x2a   : > { %1789 = vmatmul.mubr.msk.bf16.vlgmr.msra.gmra.mrb[0].mxu0 %vm468_vm0, %v1894_v19  ;;  %1730 = vmatpush3.bf16.msra.mxu1 %v1908_v60 }
  0x2b   : > { %1792 = vmatprep.mubr.msk.bf16.mxu0 %vm468_vm0, %v1895_v20  ;;  %1797 = vmatpush3.bf16.msra.mxu0 %v1897_v23 }
  0x2c   : > { %1798 = vmatprep.subr.bf16.mxu0 %v1898_v24  ;;  %1731 = vmatprep.subr.bf16.mxu1 %v1909_v2 }
  0x2e   : > { %1732 = vmatpush3.bf16.msra.mxu1 %v1910_v10 }
  0x2f   : > { %1799 = vmatpush3.bf16.msra.mxu0 %v1898_v24 }
  0x32   : > { %1793 = vmatmul.mubr.msk.bf16.gmra.mrb[4].mxu0 %vm468_vm0, %v1896_v21 }
  0x93   : > { %v575_v32 = vpop.permute.xlu0 %574 }
  0x94   : > { %v585_v33 = vpop.permute.xlu1 %584 }
  0x97   : > { %v580_v35 = vpop.permute.xlu0 %579 }
  0x98   : > { %v590_v39 = vpop.permute.xlu1 %589 }
  0x9b   : > { %v595_v50 = vpop.permute.xlu0 %594 }
  0x9c   : > { %v600_v55 = vpop.permute.xlu1 %599 }
  0x9f   : > { %v605_v3 = vpop.permute.xlu0 %604 }
  0xa0   : > { %v610_v11 = vpop.permute.xlu1 %609 }
  0xfd   : > { %v1790_v36 = vpop.f32.mrb[0].mxu0 }
  0xfe   : > { %v530_v37 = vadd.f32 %v1790_v36, %v1667_v34  ;;  %v521_v38 = vpop.f32.mrb[1].mxu0  ;;  %v1912_v36 = vld [vmem:[%s2530_s3 + $0x30] sm:$0xff]  }
  0xff   : > { %v522_v40 = vadd.f32 %v1667_v34, %v521_v38  ;;  %v1791_v41 = vpop.f32.mrb[2].mxu0 }
 0x100   : > { %v554_v42 = vmax.f32 %v530_v37, 0.0  ;;  %v533_v43 = vadd.f32 %v1791_v41, %v1667_v34  ;;  %v524_v44 = vpop.f32.mrb[3].mxu0  ;;  %v1913_v37 = vld [vmem:[%s2530_s3 + $0x78] sm:$0xff]  }
 0x101   : > { %v552_v45 = vmax.f32 %v522_v40, 0.0  ;;  %v525_v46 = vadd.f32 %v1667_v34, %v524_v44  ;;  %v865_v40 = vld [vmem:[#allocation2 + $0x4a] sm:$0xff] }
 0x102   : > { %v614_v47 = vmul.f32 %v585_v33, %v554_v42  ;;  %v555_v48 = vmax.f32 %v533_v43, 0.0 }
 0x103   : > { %v612_v51 = vmul.f32 %v575_v32, %v552_v45  ;;  %v553_v52 = vmax.f32 %v525_v46, 0.0  ;;  %v1911_v32 = vld [vmem:[%s2530_s3 + $0x70] sm:$0xff]  }
 0x104   : > { %622 = vst.msk [vmem:[#allocation2 + $0x19] sm:$0xff] %vm560_vm2, %v614_v47  ;;  %v615_v53 = vmul.f32 %v590_v39, %v555_v48  ;;  %1733 = vmatprep.subr.bf16.mxu1 %v1911_v32  ;;  %v1914_v39 = vld [vmem:[%s2530_s3 + $0x38] sm:$0xff]  }
 0x105   : > { %620 = vst.msk [vmem:[#allocation2 + $0x9] sm:$0xff] %vm560_vm2, %v612_v51  ;;  %v613_v56 = vmul.f32 %v580_v35, %v553_v52  ;;  %v1794_v57 = vpop.f32.mrb[4].mxu0  ;;  %1734 = vmatpush3.bf16.msra.mxu1 %v1912_v36 }
 0x106   : > { %623 = vst.msk [vmem:[#allocation2 + $0x21] sm:$0xff] %vm560_vm2, %v615_v53  ;;  %v546_v58 = vadd.f32 %v1794_v57, %v1667_v34  ;;  %v537_v59 = vpop.f32.mrb[5].mxu0  ;;  %1735 = vmatprep.subr.bf16.mxu1 %v1913_v37 }
 0x107   : > { %621 = vst.msk [vmem:[#allocation2 + $0x11] sm:$0xff] %vm560_vm2, %v613_v56  ;;  %v538_v61 = vadd.f32 %v1667_v34, %v537_v59  ;;  %v1795_v62 = vpop.f32.mrb[6].mxu0 }
 0x108   : > { %v558_v63 = vmax.f32 %v546_v58, 0.0  ;;  %v549_v0 = vadd.f32 %v1795_v62, %v1667_v34  ;;  %v540_v1 = vpop.f32.mrb[7].mxu0 }
 0x109   : > { %v556_v4 = vmax.f32 %v538_v61, 0.0  ;;  %v541_v5 = vadd.f32 %v1667_v34, %v540_v1  ;;  %1736 = vmatpush3.bf16.msra.mxu1 %v1914_v39 }
 0x10a   : > { %v618_v6 = vmul.f32 %v605_v3, %v558_v63  ;;  %v559_v7 = vmax.f32 %v549_v0, 0.0 }
 0x10b   : > { %v616_v12 = vmul.f32 %v595_v50, %v556_v4  ;;  %v557_v13 = vmax.f32 %v541_v5, 0.0  ;;  %v827_v20 = vld [vmem:[#allocation2 + $0x19] sm:$0xff] }
 0x10c   : > { %626 = vst.msk [vmem:[#allocation2 + $0x39] sm:$0xff] %vm560_vm2, %v618_v6  ;;  %v619_v14 = vmul.f32 %v610_v11, %v559_v7  ;;  %v648_v15 = vld [vmem:[#allocation2 + $0x9] sm:$0xff] }
 0x10d   : > { %v713_v16 = vld [vmem:[#allocation2 + $0x8] sm:$0xff]  ;;  %v2215_v17 = vld [vmem:[#allocation2 + $0x1a] sm:$0xff]  ;;  %624 = vst.msk [vmem:[#allocation2 + $0x29] sm:$0xff] %vm560_vm2, %v616_v12  ;;  %v617_v18 = vmul.f32 %v600_v55, %v557_v13  ;;  %v655_v19 = vpack.c.bf16 %v648_v15, %v647_v8 }
 0x10e   : > { %v2218_v21 = vld [vmem:[#allocation2 + $0x21] sm:$0xff]  ;;  %v639_v23 = vpack.c.bf16 %v713_v16, %v631_v9  ;;  %v858_v24 = vld [vmem:[#allocation2 + $0x12] sm:$0xff]  ;;  %627 = vst.msk [vmem:[#allocation2 + $0x41] sm:$0xff] %vm560_vm2, %v619_v14  ;;  %v762_v25 = vld [vmem:[#allocation2 + $0xa] sm:$0xff] }
 0x10f   : > { %v794_v26 = vld [vmem:[#allocation2 + $0x10] sm:$0xff]  ;;  %v755_v27 = vpack.c.bf16 %v2218_v21, %v827_v20  ;;  %625 = vst.msk [vmem:[#allocation2 + $0x31] sm:$0xff] %vm560_vm2, %v617_v18  ;;  %663 = vrot.lane.b32.xlu1 %v655_v19, %s1985_s27  ;;  %v770_v28 = vpack.c.bf16 %v858_v24, %v762_v25  ;;  %v2224_v29 = vld [vmem:[#allocation2 + $0x18] sm:$0xff]  ;;  %v866_v30 = vpack.c.bf16 %v2215_v17, %v858_v24  ;;  %v680_v33 = vld [vmem:[#allocation2 + $0x2] sm:$0xff] }
 0x110   : > { %v826_v31 = vld [vmem:[#allocation2 + $0x11] sm:$0xff]  ;;  %643 = vst.msk [vmem:[#allocation4] sm:$0xff] %vm560_vm2, %v639_v23  ;;  %v802_v34 = vpack.c.bf16 %v2224_v29, %v794_v26  ;;  %v688_v38 = vpack.c.bf16 %v762_v25, %v680_v33  ;;  %v796_v41 = vld [vmem:[#allocation2 + $0x20] sm:$0xff]  ;;  %v721_v46 = vpack.c.bf16 %v794_v26, %v713_v16  ;;  %v833_v13 = vld [vmem:[#allocation2 + $0x49] sm:$0xff] }
 0x111   : > { %v754_v35 = vpack.c.bf16 %v826_v31, %v648_v15  ;;  %759 = vst.msk [vmem:[#allocation4 + $0x20] sm:$0xff] %vm560_vm2, %v755_v27  ;;  %778 = vrot.lane.b32.xlu0 %v770_v28, %s1985_s27  ;;  %870 = vst.msk [vmem:[#allocation4 + $0x10] sm:$0xff] %vm560_vm2, %v866_v30  ;;  %v834_v53 = vpack.c.bf16 %v827_v20, %v826_v31  ;;  %v722_v3 = vpack.c.bf16 %v796_v41, %v2224_v29 }
 0x112   : > { %644 = vst.msk [vmem:[#allocation4 + $0x18] sm:$0xff] %vm560_vm2, %v802_v34 }
 0x113   : > { %758 = vst.msk [vmem:[#allocation4 + $0x8] sm:$0xff] %vm560_vm2, %v754_v35  ;;  %696 = vrot.lane.b32.xlu1 %v688_v38, %s1986_s12  ;;  %v654_v57 = vld [vmem:[#allocation2 + $0x39] sm:$0xff] }
 0x114   : > { %v797_v42 = vld [vmem:[#allocation2 + $0x28] sm:$0xff] }
 0x115   : > { %v860_v43 = vld [vmem:[#allocation2 + $0x22] sm:$0xff]  ;;  %v863_v44 = vld [vmem:[#allocation2 + $0x3a] sm:$0xff]  ;;  %810 = vrot.lane.b32.xlu0 %v802_v34, %s1986_s12  ;;  %v803_v47 = vpack.c.bf16 %v797_v42, %v796_v41 }
 0x116   : > { %v864_v45 = vld [vmem:[#allocation2 + $0x42] sm:$0xff]  ;;  %v861_v48 = vld [vmem:[#allocation2 + $0x2a] sm:$0xff]  ;;  %v862_v49 = vld [vmem:[#allocation2 + $0x32] sm:$0xff]  ;;  %v771_v0 = vpack.c.bf16 %v860_v43, %v2215_v17 }
 0x117   : > { %v869_v50 = vpack.c.bf16 %v865_v40, %v864_v45  ;;  %v718_v51 = vld [vmem:[#allocation2 + $0x30] sm:$0xff]  ;;  %v867_v52 = vpack.c.bf16 %v861_v48, %v860_v43  ;;  %729 = vrot.lane.b32.xlu1 %v721_v46, %s1987_s14  ;;  %v868_v54 = vpack.c.bf16 %v863_v44, %v862_v49  ;;  %v799_v55 = vld [vmem:[#allocation2 + $0x38] sm:$0xff]  ;;  %645 = vst.msk [vmem:[#allocation4 + $0x30] sm:$0xff] %vm560_vm2, %v803_v47  ;;  %v832_v61 = vld [vmem:[#allocation2 + $0x41] sm:$0xff] }
 0x118   : > { %v653_v56 = vld [vmem:[#allocation2 + $0x31] sm:$0xff]  ;;  %v876_v58 = vld [vmem:[#allocation4 + $0x10] sm:$0xff]  ;;  %v829_v59 = vld [vmem:[#allocation2 + $0x29] sm:$0xff]  ;;  %v804_v60 = vpack.c.bf16 %v799_v55, %v718_v51  ;;  %v757_v62 = vpack.c.bf16 %v832_v61, %v654_v57  ;;  %v773_v5 = vpack.c.bf16 %v864_v45, %v863_v44  ;;  %v772_v7 = vpack.c.bf16 %v862_v49, %v861_v48 }
 0x119   : > { %873 = vst.msk [vmem:[#allocation4 + $0x58] sm:$0xff] %vm560_vm2, %v869_v50  ;;  %871 = vst.msk [vmem:[#allocation4 + $0x28] sm:$0xff] %vm560_vm2, %v867_v52  ;;  %1800 = vmatprep.mubr.msk.bf16.mxu0 %vm560_vm2, %v876_v58  ;;  %842 = vrot.lane.b32.xlu0 %v834_v53, %s1987_s14  ;;  %v756_v63 = vpack.c.bf16 %v653_v56, %v829_v59  ;;  %v835_v4 = vpack.c.bf16 %v829_v59, %v2218_v21  ;;  %v800_v10 = vld [vmem:[#allocation2 + $0x40] sm:$0xff]  ;;  %v801_v11 = vld [vmem:[#allocation2 + $0x48] sm:$0xff] }
 0x11a   : > { %872 = vst.msk [vmem:[#allocation4 + $0x40] sm:$0xff] %vm560_vm2, %v868_v54  ;;  %646 = vst.msk [vmem:[#allocation4 + $0x48] sm:$0xff] %vm560_vm2, %v804_v60  ;;  %v723_v8 = vpack.c.bf16 %v718_v51, %v797_v42  ;;  %v658_v9 = vpack.c.bf16 %v654_v57, %v653_v56  ;;  %v805_v12 = vpack.c.bf16 %v801_v11, %v800_v10  ;;  %v2317_v58 = vld [vmem:[%s2531_s4] ss:$0 sm:$0xff] }
 0x11b   : > { %665 = vrot.lane.b32.xlu1 %v834_v53, %s1985_s27  ;;  %761 = vst.msk [vmem:[#allocation4 + $0x50] sm:$0xff] %vm560_vm2, %v757_v62  ;;  %760 = vst.msk [vmem:[#allocation4 + $0x38] sm:$0xff] %vm560_vm2, %v756_v63  ;;  %v724_v14 = vpack.c.bf16 %v800_v10, %v799_v55  ;;  %v837_v15 = vpack.c.bf16 %v833_v13, %v832_v61 }
 0x11d   : > { %780 = vrot.lane.b32.xlu0 %v771_v0, %s1985_s27 }
 0x11f   : > { %698 = vrot.lane.b32.xlu1 %v866_v30, %s1986_s12 }
 0x120   : > { %v879_v1 = vld [vmem:[#allocation4 + $0x28] sm:$0xff]  ;;  %v885_v6 = vld [vmem:[#allocation4 + $0x58] sm:$0xff] }
 0x121   : > { %v882_v2 = vld [vmem:[#allocation4 + $0x40] sm:$0xff]  ;;  %1801 = vmatmul.mubr.msk.bf16.vlgmr.msra.gmra.mrb[8].mxu0 %vm560_vm2, %v879_v1  ;;  %812 = vrot.lane.b32.xlu0 %v803_v47, %s1986_s12  ;;  %v1208_v1 = vlaneseq }
 0x122   : > { %1804 = vmatprep.mubr.msk.bf16.mxu0 %vm560_vm2, %v882_v2 }
 0x123   : > { %731 = vrot.lane.b32.xlu1 %v722_v3, %s1987_s14 }
 0x125   : > { %844 = vrot.lane.b32.xlu0 %v835_v4, %s1987_s14 }
 0x127   : > { %667 = vrot.lane.b32.xlu1 %v835_v4, %s1985_s27 }
 0x129   : > { %1805 = vmatmul.mubr.msk.bf16.gmra.mrb[12].mxu0 %vm560_vm2, %v885_v6  ;;  %784 = vrot.lane.b32.xlu0 %v773_v5, %s1985_s27  ;;  %v1209_v6 = vshrl.u32 %v1208_v1, 7 }
 0x12a   : > { %1824 = vmatprep.mubr.msk.f32.mxu0 %vm1989_vm8, %v1984_v22  ;;  %v1451_v22 = vld [vmem:[%s2536_s9 + $0x10] sm:$0xff] }
 0x12b   : > { %700 = vrot.lane.b32.xlu1 %v867_v52, %s1986_s12  ;;  %v1210_v11 = vsub.s32 0, %v1209_v6 }
 0x12d   : > { %782 = vrot.lane.b32.xlu0 %v772_v7, %s1985_s27 }
 0x12f   : > { %733 = vrot.lane.b32.xlu1 %v723_v8, %s1987_s14 }
 0x131   : > { %814 = vrot.lane.b32.xlu0 %v804_v60, %s1986_s12 }
 0x133   : > { %669 = vrot.lane.b32.xlu1 %v658_v9, %s1985_s27 }
 0x135   : > { %846 = vrot.lane.b32.xlu0 %v658_v9, %s1987_s14  ;;  %v1230_v9 = vsub.s32 1, %v1209_v6 }
 0x137   : > { %702 = vrot.lane.b32.xlu1 %v868_v54, %s1986_s12 }
 0x139   : > { %816 = vrot.lane.b32.xlu0 %v805_v12, %s1986_s12  ;;  %s1919_s12 = scalar_lea.vmem %s2487_s23, 16 }
 0x13a   : > { %p1920_p11 = scmp.ne.s32.totalorder %s2487_s23, %s1919_s12 }
 0x13b   : > { %735 = vrot.lane.b32.xlu1 %v724_v14, %s1987_s14  ;;  %v1198_v14 = vld [vmem:[%s2532_s5] sm:$0xff] }
 0x13c   : > { %p1921_p12 = pnand %p1920_p11, %p2092_p5 }
 0x13d   : > { %848 = vrot.lane.b32.xlu0 %v837_v15, %s1987_s14  ;;  %s1923_s14 = sshll.u32 %s1990_s6, 4  ;;  %s1924_s14 = int_to_ptr.vmem [resolvable:$false] %s1923_s14 }
 0x13e   : > { %p1922_p13 = pneg %p1921_p12  ;;  %s1925_s16 = scalar_lea.vmem %s1924_s14, 32 }
 0x13f   : > { %p1926_p0 = scmp.lt.s32.totalorder %s2487_s23, %s1924_s14  ;;  %p1927_p1 = scmp.lt.s32.totalorder %s1925_s16, %s1919_s12 }
 0x141   : > { %p1928_p2 = por %p1927_p1, %p1926_p0 }
 0x143   : > { %p1929_p3 = pnand %p1928_p2, %p1922_p13 }
 0x181   : > { %v664_v16 = vpop.permute.xlu1 %663 }
 0x182   : > { %676 = vst.msk [vmem:[#allocation4] sm:$0xff] %vm675_vm5, %v664_v16 }
 0x183   : > { %v779_v17 = vpop.permute.xlu0 %778 }
 0x184   : > { %790 = vst.msk [vmem:[#allocation4 + $0x8] sm:$0xff] %vm675_vm5, %v779_v17 }
 0x185   : > { %v697_v18 = vpop.permute.xlu1 %696 }
 0x186   : > { %709 = vst.msk [vmem:[#allocation4] sm:$0xff] %vm708_vm6, %v697_v18  ;;  %v2327_v18 = vrot.slane %v1198_v14, %v1230_v9 }
 0x187   : > { %v811_v19 = vpop.permute.xlu0 %810 }
 0x188   : > { %822 = vst.msk [vmem:[#allocation4 + $0x8] sm:$0xff] %vm708_vm6, %v811_v19  ;;  %v2329_v19 = vrot.slane %v1198_v14, %v1210_v11 }
 0x189   : > { %v730_v20 = vpop.permute.xlu1 %729 }
 0x18a   : > { %742 = vst.msk [vmem:[#allocation4] sm:$0xff] %vm741_vm7, %v730_v20  ;;  %v1258_v20 = vsub.s32 2, %v1209_v6 }
 0x18b   : > { %v843_v21 = vpop.permute.xlu0 %842 }
 0x18c   : > { %854 = vst.msk [vmem:[#allocation4 + $0x8] sm:$0xff] %vm741_vm7, %v843_v21 }
 0x18d   : > { %v666_v23 = vpop.permute.xlu1 %665 }
 0x18e   : > { %677 = vst.msk [vmem:[#allocation4 + $0x18] sm:$0xff] %vm675_vm5, %v666_v23 }
 0x18f   : > { %v781_v24 = vpop.permute.xlu0 %780 }
 0x190   : > { %791 = vst.msk [vmem:[#allocation4 + $0x20] sm:$0xff] %vm675_vm5, %v781_v24 }
 0x191   : > { %v699_v25 = vpop.permute.xlu1 %698  ;;  %v874_v28 = vld [vmem:[#allocation4] sm:$0xff] }
 0x192   : > { %710 = vst.msk [vmem:[#allocation4 + $0x18] sm:$0xff] %vm708_vm6, %v699_v25 }
 0x193   : > { %v813_v26 = vpop.permute.xlu0 %812  ;;  %v875_v27 = vld [vmem:[#allocation4 + $0x8] sm:$0xff] }
 0x194   : > { %823 = vst.msk [vmem:[#allocation4 + $0x20] sm:$0xff] %vm708_vm6, %v813_v26  ;;  %1081 = vmatprep.mubr.bf16.mxu1 %v875_v27 }
 0x195   : > { %v732_v29 = vpop.permute.xlu1 %731  ;;  %1082 = vmatmul.mubr.bf16.vlgmr.msra.gmra.mrb[0].mxu1 %v874_v28 }
 0x196   : > { %743 = vst.msk [vmem:[#allocation4 + $0x18] sm:$0xff] %vm741_vm7, %v732_v29 }
 0x197   : > { %v845_v30 = vpop.permute.xlu0 %844 }
 0x198   : > { %855 = vst.msk [vmem:[#allocation4 + $0x20] sm:$0xff] %vm741_vm7, %v845_v30  ;;  %v2334_v30 = vrot.slane %v1198_v14, %v1258_v20 }
 0x199   : > { %v668_v31 = vpop.permute.xlu1 %667 }
 0x19a   : > { %678 = vst.msk [vmem:[#allocation4 + $0x30] sm:$0xff] %vm675_vm5, %v668_v31  ;;  %v1279_v31 = vsub.s32 3, %v1209_v6 }
 0x19b   : > { %v785_v32 = vpop.permute.xlu0 %784 }
 0x19c   : > { %793 = vst.msk [vmem:[#allocation4 + $0x50] sm:$0xff] %vm675_vm5, %v785_v32 }
 0x19d   : > { %v701_v33 = vpop.permute.xlu1 %700  ;;  %v877_v36 = vld [vmem:[#allocation4 + $0x18] sm:$0xff] }
 0x19e   : > { %711 = vst.msk [vmem:[#allocation4 + $0x30] sm:$0xff] %vm708_vm6, %v701_v33 }
 0x19f   : > { %v783_v34 = vpop.permute.xlu0 %782  ;;  %v878_v35 = vld [vmem:[#allocation4 + $0x20] sm:$0xff] }
 0x1a0   : > { %792 = vst.msk [vmem:[#allocation4 + $0x38] sm:$0xff] %vm675_vm5, %v783_v34  ;;  %1089 = vmatprep.mubr.bf16.mxu1 %v878_v35  ;;  %v1300_v35 = vsub.s32 4, %v1209_v6 }
 0x1a1   : > { %v734_v37 = vpop.permute.xlu1 %733  ;;  %1090 = vmatmul.mubr.bf16.gmra.mrb[4].mxu1 %v877_v36 }
 0x1a2   : > { %744 = vst.msk [vmem:[#allocation4 + $0x30] sm:$0xff] %vm741_vm7, %v734_v37  ;;  %v2339_v37 = vrot.slane %v1198_v14, %v1279_v31 }
 0x1a3   : > { %v815_v38 = vpop.permute.xlu0 %814 }
 0x1a4   : > { %824 = vst.msk [vmem:[#allocation4 + $0x38] sm:$0xff] %vm708_vm6, %v815_v38  ;;  %v1321_v38 = vsub.s32 5, %v1209_v6 }
 0x1a5   : > { %v670_v39 = vpop.permute.xlu1 %669 }
 0x1a6   : > { %679 = vst.msk [vmem:[#allocation4 + $0x48] sm:$0xff] %vm675_vm5, %v670_v39 }
 0x1a7   : > { %v847_v40 = vpop.permute.xlu0 %846 }
 0x1a8   : > { %856 = vst.msk [vmem:[#allocation4 + $0x38] sm:$0xff] %vm741_vm7, %v847_v40 }
 0x1a9   : > { %v703_v41 = vpop.permute.xlu1 %702  ;;  %v880_v46 = vld [vmem:[#allocation4 + $0x30] sm:$0xff] }
 0x1aa   : > { %712 = vst.msk [vmem:[#allocation4 + $0x48] sm:$0xff] %vm708_vm6, %v703_v41  ;;  %v2341_v41 = vrot.slane %v1198_v14, %v1300_v35 }
 0x1ab   : > { %v817_v42 = vpop.permute.xlu0 %816 }
 0x1ac   : > { %825 = vst.msk [vmem:[#allocation4 + $0x50] sm:$0xff] %vm708_vm6, %v817_v42  ;;  %v1342_v42 = vsub.s32 6, %v1209_v6 }
 0x1ad   : > { %v736_v43 = vpop.permute.xlu1 %735 }
 0x1ae   : > { %745 = vst.msk [vmem:[#allocation4 + $0x48] sm:$0xff] %vm741_vm7, %v736_v43 }
 0x1af   : > { %v849_v44 = vpop.permute.xlu0 %848  ;;  %v881_v45 = vld [vmem:[#allocation4 + $0x38] sm:$0xff] }
 0x1b0   : > { %857 = vst.msk [vmem:[#allocation4 + $0x50] sm:$0xff] %vm741_vm7, %v849_v44  ;;  %1097 = vmatprep.mubr.bf16.mxu1 %v881_v45 }
 0x1b1   : > { %1098 = vmatmul.mubr.bf16.gmra.mrb[8].mxu1 %v880_v46 }
 0x1b5   : > { %v883_v48 = vld [vmem:[#allocation4 + $0x48] sm:$0xff] }
 0x1b7   : > { %v884_v47 = vld [vmem:[#allocation4 + $0x50] sm:$0xff] }
 0x1b8   : > { %1105 = vmatprep.mubr.bf16.mxu1 %v884_v47  ;;  %v2344_v47 = vrot.slane %v1198_v14, %v1321_v38 }
 0x1b9   : > { %1106 = vmatmul.mubr.bf16.gmra.mrb[12].mxu1 %v883_v48  ;;  %v1363_v48 = vsub.s32 7, %v1209_v6 }
 0x1f4   : > { %v1802_v49 = vpop.f32.mrb[8].mxu0 }
 0x1f5   : > { %v1148_v50 = vpop.f32.mrb[9].mxu0 }
 0x1f6   : > { %v1803_v51 = vpop.f32.mrb[10].mxu0 }
 0x1f7   : > { %v1151_v52 = vpop.f32.mrb[11].mxu0 }
 0x1fc   : > { %v2306_v53 = vpop.f32.mrb[12].mxu0 }
 0x1fd   : > { %v2308_v54 = vpop.f32.mrb[13].mxu0 }
 0x1fe   : > { %v2310_v55 = vpop.f32.mrb[14].mxu0 }
 0x1ff   : > { %v2312_v56 = vpop.f32.mrb[15].mxu0 }
 0x268   : > { %v1737_v57 = vpop.f32.mrb[0].mxu1 }
 0x269   : > { %v1738_v59 = vpop.f32.mrb[1].mxu1 }
 0x26a   : > { %v1739_v60 = vadd.f32 %v1738_v59, %v1737_v57  ;;  %v1740_v61 = vpop.f32.mrb[2].mxu1 }
 0x26b   : > { %v1741_v62 = vpop.f32.mrb[3].mxu1 }
 0x26c   : > { %v1084_v63 = vadd.f32 %v1739_v60, %v2317_v58  ;;  %v1742_v0 = vadd.f32 %v1741_v62, %v1740_v61  ;;  %v2348_v61 = vrot.slane %v1198_v14, %v1342_v42 }
 0x26e   : > { %v1149_v2 = vadd.f32 %v1148_v50, %v1084_v63  ;;  %v1087_v3 = vadd.f32 %v1742_v0, %v2317_v58 }
 0x270   : > { %v1179_v4 = vmax.f32 %v1149_v2, 0.0  ;;  %v1152_v5 = vadd.f32 %v1151_v52, %v1087_v3 }
 0x272   : > { %1187 = vst.msk [vmem:[#allocation3] sm:$0xff] %vm560_vm2, %v1179_v4  ;;  %v1180_v7 = vmax.f32 %v1152_v5, 0.0  ;;  %v2353_v5 = vrot.slane %v1198_v14, %v1363_v48  ;;  %v2364_v14 = vld [vmem:[%s2532_s5 + $0x8] ss:$0 sm:$0xff] }
 0x274   : > { %1188 = vst.msk [vmem:[#allocation3 + $0x8] sm:$0xff] %vm560_vm2, %v1180_v7  ;;  %v1743_v8 = vpop.f32.mrb[4].mxu1 }
 0x275   : > { %v1744_v10 = vpop.f32.mrb[5].mxu1 }
 0x276   : > { %v1745_v12 = vadd.f32 %v1744_v10, %v1743_v8  ;;  %v1746_v13 = vpop.f32.mrb[6].mxu1 }
 0x277   : > { %v1747_v15 = vpop.f32.mrb[7].mxu1 }
 0x278   : > { %v1092_v16 = vadd.f32 %v1745_v12, %v2317_v58  ;;  %v1748_v17 = vadd.f32 %v1747_v15, %v1746_v13 }
 0x279   : > { %v1200_v24 = vld [vmem:[#allocation3] sm:$0xff] }
 0x27a   : > { %v1157_v21 = vadd.f32 %v1802_v49, %v1092_v16  ;;  %v1095_v23 = vadd.f32 %v1748_v17, %v2317_v58  ;;  %v1212_v29 = vmul.f32 %v2329_v19, %v1200_v24 }
 0x27b   : > { %v1220_v25 = vld [vmem:[#allocation3 + $0x1] sm:$0xff] }
 0x27c   : > { %v1181_v26 = vmax.f32 %v1157_v21, 0.0  ;;  %v1160_v27 = vadd.f32 %v1803_v51, %v1095_v23  ;;  %v1232_v28 = vmul.f32 %v2327_v18, %v1220_v25  ;;  %v1248_v33 = vld [vmem:[#allocation3 + $0x2] sm:$0xff] }
 0x27d   : > { %v1260_v36 = vmul.f32 %v2334_v30, %v1248_v33  ;;  %v1201_v39 = vld [vmem:[#allocation3 + $0x8] sm:$0xff] }
 0x27e   : > { %1189 = vst.msk [vmem:[#allocation3 + $0x10] sm:$0xff] %vm560_vm2, %v1181_v26  ;;  %v1182_v32 = vmax.f32 %v1160_v27, 0.0  ;;  %v1240_v34 = vadd.f32 %v1232_v28, %v1212_v29  ;;  %v1281_v46 = vmul.f32 %v2339_v37, %v1201_v39  ;;  %v1213_v2 = vmul.f32 %v2329_v19, %v1201_v39 }
 0x280   : > { %1190 = vst.msk [vmem:[#allocation3 + $0x18] sm:$0xff] %vm560_vm2, %v1182_v32  ;;  %v1268_v40 = vadd.f32 %v1260_v36, %v1240_v34 }
 0x282   : > { %v1289_v59 = vadd.f32 %v1281_v46, %v1268_v40 }
 0x284   : > { %v1749_v43 = vpop.f32.mrb[8].mxu1 }
 0x285   : > { %v1750_v44 = vpop.f32.mrb[9].mxu1  ;;  %v1221_v45 = vld [vmem:[#allocation3 + $0x9] sm:$0xff] }
 0x286   : > { %v1751_v49 = vadd.f32 %v1750_v44, %v1749_v43  ;;  %v1752_v50 = vpop.f32.mrb[10].mxu1  ;;  %v1249_v51 = vld [vmem:[#allocation3 + $0xa] sm:$0xff]  ;;  %v1233_v57 = vmul.f32 %v2327_v18, %v1221_v45  ;;  %v1302_v60 = vmul.f32 %v2341_v41, %v1221_v45 }
 0x287   : > { %v1753_v52 = vpop.f32.mrb[11].mxu1  ;;  %v1202_v0 = vld [vmem:[#allocation3 + $0x10] sm:$0xff]  ;;  %v1323_v4 = vmul.f32 %v2344_v47, %v1249_v51  ;;  %v1261_v8 = vmul.f32 %v2334_v30, %v1249_v51  ;;  %v1203_v45 = vld [vmem:[#allocation3 + $0x18] sm:$0xff] }
 0x288   : > { %v1100_v62 = vadd.f32 %v1751_v49, %v2317_v58  ;;  %v1754_v63 = vadd.f32 %v1753_v52, %v1752_v50  ;;  %v1222_v1 = vld [vmem:[#allocation3 + $0x11] sm:$0xff]  ;;  %v1310_v3 = vadd.f32 %v1302_v60, %v1289_v59  ;;  %v1344_v11 = vmul.f32 %v2348_v61, %v1202_v0 }
 0x289   : > { %v1234_v9 = vmul.f32 %v2327_v18, %v1222_v1  ;;  %v1241_v12 = vadd.f32 %v1233_v57, %v1213_v2  ;;  %v1250_v17 = vld [vmem:[#allocation3 + $0x12] sm:$0xff]  ;;  %v1282_v21 = vmul.f32 %v2339_v37, %v1202_v0  ;;  %v1365_v24 = vmul.f32 %v2353_v5, %v1222_v1 }
 0x28a   : > { %v1165_v6 = vadd.f32 %v2308_v54, %v1100_v62  ;;  %v1103_v7 = vadd.f32 %v1754_v63, %v2317_v58  ;;  %v1331_v10 = vadd.f32 %v1323_v4, %v1310_v3  ;;  %v1214_v54 = vmul.f32 %v2329_v19, %v1202_v0 }
 0x28b   : > { %v1269_v25 = vadd.f32 %v1261_v8, %v1241_v12  ;;  %v1303_v28 = vmul.f32 %v2341_v41, %v1222_v1  ;;  %v1386_v33 = vmul.f32 %v2364_v14, %v1250_v17  ;;  %v1262_v38 = vmul.f32 %v2334_v30, %v1250_v17 }
 0x28c   : > { %v1183_v13 = vmax.f32 %v1165_v6, 0.0  ;;  %v1168_v15 = vadd.f32 %v2312_v56, %v1103_v7  ;;  %v1755_v16 = vpop.f32.mrb[12].mxu1  ;;  %v1352_v23 = vadd.f32 %v1344_v11, %v1331_v10  ;;  %v1242_v31 = vadd.f32 %v1234_v9, %v1214_v54 }
 0x28d   : > { %v1756_v20 = vpop.f32.mrb[13].mxu1  ;;  %v1290_v34 = vadd.f32 %v1282_v21, %v1269_v25  ;;  %v1324_v39 = vmul.f32 %v2344_v47, %v1250_v17  ;;  %v1283_v59 = vmul.f32 %v2339_v37, %v1203_v45  ;;  %v1345_v60 = vmul.f32 %v2348_v61, %v1203_v45 }
 0x28e   : > { %1191 = vst.msk [vmem:[#allocation3 + $0x20] sm:$0xff] %vm560_vm2, %v1183_v13  ;;  %v1184_v26 = vmax.f32 %v1168_v15, 0.0  ;;  %v1757_v56 = vadd.f32 %v1756_v20, %v1755_v16  ;;  %v1758_v27 = vpop.f32.mrb[14].mxu1  ;;  %v1373_v32 = vadd.f32 %v1365_v24, %v1352_v23  ;;  %v1270_v46 = vadd.f32 %v1262_v38, %v1242_v31 }
 0x28f   : > { %v1759_v29 = vpop.f32.mrb[15].mxu1  ;;  %v1311_v42 = vadd.f32 %v1303_v28, %v1290_v34 }
 0x290   : > { %1192 = vst.msk [vmem:[#allocation3 + $0x28] sm:$0xff] %vm560_vm2, %v1184_v26  ;;  %v1108_v35 = vadd.f32 %v1757_v56, %v2317_v58  ;;  %v1760_v36 = vadd.f32 %v1759_v29, %v1758_v27  ;;  %v1394_v40 = vadd.f32 %v1386_v33, %v1373_v32  ;;  %v1291_v3 = vadd.f32 %v1283_v59, %v1270_v46 }
 0x291   : > { %v1332_v49 = vadd.f32 %v1324_v39, %v1311_v42  ;;  %v1276_v42 = vld [vmem:[#allocation3 + $0x40] sm:$0xff] }
 0x292   : > { %v1173_v43 = vadd.f32 %v2306_v53, %v1108_v35  ;;  %v1111_v44 = vadd.f32 %v1760_v36, %v2317_v58  ;;  %v1402_v48 = vsel %vm560_vm2, %v1394_v40, 0.0  ;;  %v1215_v58 = vmul.f32 %v2329_v19, %v1203_v45 }
 0x293   : > { %1403 = vadd.xlane.f32.xlu0 %v1402_v48  ;;  %v1353_v1 = vadd.f32 %v1345_v60, %v1332_v49 }
 0x294   : > { %v1185_v50 = vmax.f32 %v1173_v43, 0.0  ;;  %v1176_v51 = vadd.f32 %v2310_v55, %v1111_v44  ;;  %v2404_v43 = vld [vmem:[#allocation3 + $0x41] sm:$0xff] }
 0x295   : > { %v1223_v52 = vld [vmem:[#allocation3 + $0x19] sm:$0xff] }
 0x296   : > { %v1251_v57 = vld [vmem:[#allocation3 + $0x1a] sm:$0xff]  ;;  %1193 = vst.msk [vmem:[#allocation3 + $0x30] sm:$0xff] %vm560_vm2, %v1185_v50  ;;  %v1186_v53 = vmax.f32 %v1176_v51, 0.0  ;;  %v1235_v63 = vmul.f32 %v2327_v18, %v1223_v52  ;;  %v1304_v0 = vmul.f32 %v2341_v41, %v1223_v52  ;;  %v1366_v55 = vmul.f32 %v2353_v5, %v1223_v52 }
 0x297   : > { %v1204_v62 = vld [vmem:[#allocation3 + $0x20] sm:$0xff]  ;;  %v1263_v6 = vmul.f32 %v2334_v30, %v1251_v57  ;;  %v1325_v10 = vmul.f32 %v2344_v47, %v1251_v57  ;;  %v1387_v12 = vmul.f32 %v2364_v14, %v1251_v57  ;;  %v1205_v24 = vld [vmem:[#allocation3 + $0x28] sm:$0xff] }
 0x298   : > { %v1224_v2 = vld [vmem:[#allocation3 + $0x21] sm:$0xff]  ;;  %1194 = vst.msk [vmem:[#allocation3 + $0x38] sm:$0xff] %vm560_vm2, %v1186_v53  ;;  %v1243_v4 = vadd.f32 %v1235_v63, %v1215_v58  ;;  %v1216_v7 = vmul.f32 %v2329_v19, %v1204_v62  ;;  %v1374_v11 = vadd.f32 %v1366_v55, %v1353_v1  ;;  %v1312_v13 = vadd.f32 %v1304_v0, %v1291_v3 }
 0x299   : > { %v1236_v8 = vmul.f32 %v2327_v18, %v1224_v2  ;;  %v1252_v9 = vld [vmem:[#allocation3 + $0x22] sm:$0xff]  ;;  %v1284_v54 = vmul.f32 %v2339_v37, %v1204_v62  ;;  %v1346_v23 = vmul.f32 %v2348_v61, %v1204_v62  ;;  %v1305_v25 = vmul.f32 %v2341_v41, %v1224_v2 }
 0x29a   : > { %v1271_v15 = vadd.f32 %v1263_v6, %v1243_v4  ;;  %v1395_v17 = vadd.f32 %v1387_v12, %v1374_v11  ;;  %v1264_v20 = vmul.f32 %v2334_v30, %v1252_v9  ;;  %v1333_v21 = vadd.f32 %v1325_v10, %v1312_v13 }
 0x29b   : > { %v1244_v16 = vadd.f32 %v1236_v8, %v1216_v7  ;;  %v1326_v26 = vmul.f32 %v2344_v47, %v1252_v9  ;;  %v1367_v56 = vmul.f32 %v2353_v5, %v1224_v2  ;;  %v1388_v32 = vmul.f32 %v2364_v14, %v1252_v9 }
 0x29c   : > { %v1292_v27 = vadd.f32 %v1284_v54, %v1271_v15  ;;  %v1405_v28 = vsel %vm560_vm2, %v1395_v17, 0.0  ;;  %v1354_v31 = vadd.f32 %v1346_v23, %v1333_v21  ;;  %v1217_v36 = vmul.f32 %v2329_v19, %v1205_v24 }
 0x29d   : > { %v1272_v29 = vadd.f32 %v1264_v20, %v1244_v16  ;;  %v1225_v33 = vld [vmem:[#allocation3 + $0x29] sm:$0xff]  ;;  %1406 = vadd.xlane.f32.xlu1 %v1405_v28  ;;  %v1285_v39 = vmul.f32 %v2339_v37, %v1205_v24  ;;  %v1347_v48 = vmul.f32 %v2348_v61, %v1205_v24  ;;  %v1288_v53 = vmul.f32 %v2339_v37, %v1276_v42 }
 0x29e   : > { %v1253_v34 = vld [vmem:[#allocation3 + $0x2a] sm:$0xff]  ;;  %v1237_v38 = vmul.f32 %v2327_v18, %v1225_v33  ;;  %v1313_v40 = vadd.f32 %v1305_v25, %v1292_v27  ;;  %v1375_v44 = vadd.f32 %v1367_v56, %v1354_v31  ;;  %v1306_v46 = vmul.f32 %v2341_v41, %v1225_v33  ;;  %v1318_v28 = vld [vmem:[#allocation3 + $0x42] sm:$0xff] }
 0x29f   : > { %v1206_v35 = vld [vmem:[#allocation3 + $0x30] sm:$0xff]  ;;  %v1265_v45 = vmul.f32 %v2334_v30, %v1253_v34  ;;  %v1293_v62 = vadd.f32 %v1285_v39, %v1272_v29  ;;  %v1309_v58 = vmul.f32 %v2341_v41, %v2404_v43  ;;  %v1368_v1 = vmul.f32 %v2353_v5, %v1225_v33  ;;  %v1207_v2 = vld [vmem:[#allocation3 + $0x38] sm:$0xff] }
 0x2a0   : > { %v1226_v49 = vld [vmem:[#allocation3 + $0x31] sm:$0xff]  ;;  %v1245_v50 = vadd.f32 %v1237_v38, %v1217_v36  ;;  %v1334_v51 = vadd.f32 %v1326_v26, %v1313_v40  ;;  %v1218_v52 = vmul.f32 %v2329_v19, %v1206_v35  ;;  %v1396_v60 = vadd.f32 %v1388_v32, %v1375_v44  ;;  %v1227_v3 = vld [vmem:[#allocation3 + $0x39] sm:$0xff]  ;;  %v1339_v36 = vld [vmem:[#allocation3 + $0x48] sm:$0xff] }
 0x2a1   : > { %v1238_v57 = vmul.f32 %v2327_v18, %v1226_v49  ;;  %v1254_v59 = vld [vmem:[#allocation3 + $0x32] sm:$0xff]  ;;  %v1327_v6 = vmul.f32 %v2344_v47, %v1253_v34  ;;  %v1314_v8 = vadd.f32 %v1306_v46, %v1293_v62  ;;  %v1389_v10 = vmul.f32 %v2364_v14, %v1253_v34  ;;  %v1255_v13 = vld [vmem:[#allocation3 + $0x3a] sm:$0xff] }
 0x2a2   : > { %v1273_v63 = vadd.f32 %v1265_v45, %v1245_v50  ;;  %v1355_v0 = vadd.f32 %v1347_v48, %v1334_v51  ;;  %v1408_v4 = vsel %vm560_vm2, %v1396_v60, 0.0  ;;  %v1266_v7 = vmul.f32 %v2334_v30, %v1254_v59 }
 0x2a3   : > { %v1246_v55 = vadd.f32 %v1238_v57, %v1218_v52  ;;  %1409 = vadd.xlane.f32.xlu0 %v1408_v4  ;;  %v1286_v11 = vmul.f32 %v2339_v37, %v1206_v35  ;;  %v1348_v12 = vmul.f32 %v2348_v61, %v1206_v35  ;;  %v1335_v16 = vadd.f32 %v1327_v6, %v1314_v8  ;;  %v1706_v8 = vld [vmem:[#allocation5] ss:$0 sm:$0xff] }
 0x2a4   : > { %v1376_v9 = vadd.f32 %v1368_v1, %v1355_v0  ;;  %v1219_v54 = vmul.f32 %v2329_v19, %v1207_v2  ;;  %v1239_v17 = vmul.f32 %v2327_v18, %v1227_v3  ;;  %v1307_v21 = vmul.f32 %v2341_v41, %v1226_v49 }
 0x2a5   : > { %v1274_v15 = vadd.f32 %v1266_v7, %v1246_v55  ;;  %v1369_v23 = vmul.f32 %v2353_v5, %v1226_v49  ;;  %v1294_v24 = vadd.f32 %v1286_v11, %v1273_v63  ;;  %v1356_v25 = vadd.f32 %v1348_v12, %v1335_v16 }
 0x2a6   : > { %v1397_v20 = vadd.f32 %v1389_v10, %v1376_v9  ;;  %v1247_v26 = vadd.f32 %v1239_v17, %v1219_v54  ;;  %v1267_v56 = vmul.f32 %v2334_v30, %v1255_v13  ;;  %v1287_v27 = vmul.f32 %v2339_v37, %v1207_v2 }
 0x2a7   : > { %v1328_v31 = vmul.f32 %v2344_v47, %v1254_v59  ;;  %v1390_v19 = vmul.f32 %v2364_v14, %v1254_v59  ;;  %v1315_v18 = vadd.f32 %v1307_v21, %v1294_v24  ;;  %v1377_v32 = vadd.f32 %v1369_v23, %v1356_v25 }
 0x2a8   : > { %v1411_v29 = vsel %vm560_vm2, %v1397_v20, 0.0  ;;  %v1275_v33 = vadd.f32 %v1267_v56, %v1247_v26  ;;  %v1308_v34 = vmul.f32 %v2341_v41, %v1227_v3  ;;  %v1295_v35 = vadd.f32 %v1287_v27, %v1274_v15  ;;  %v1360_v41 = vld [vmem:[#allocation3 + $0x49] sm:$0xff] }
 0x2a9   : > { %1412 = vadd.xlane.f32.xlu0 %v1411_v29  ;;  %v1336_v38 = vadd.f32 %v1328_v31, %v1315_v18  ;;  %v1349_v30 = vmul.f32 %v2348_v61, %v1207_v2  ;;  %v1330_v37 = vmul.f32 %v2344_v47, %v1318_v28  ;;  %v1350_v39 = vmul.f32 %v2348_v61, %v1276_v42 }
 0x2aa   : > { %v1398_v40 = vadd.f32 %v1390_v19, %v1377_v32  ;;  %v1329_v44 = vmul.f32 %v2344_v47, %v1255_v13  ;;  %v1316_v45 = vadd.f32 %v1308_v34, %v1295_v35  ;;  %v1296_v46 = vadd.f32 %v1288_v53, %v1275_v33  ;;  %v1381_v47 = vld [vmem:[#allocation3 + $0x4a] sm:$0xff] }
 0x2ab   : > { %v1357_v48 = vadd.f32 %v1349_v30, %v1336_v38  ;;  %v1370_v49 = vmul.f32 %v2353_v5, %v1227_v3  ;;  %v1351_v50 = vmul.f32 %v2348_v61, %v1339_v36  ;;  %v1371_v57 = vmul.f32 %v2353_v5, %v2404_v43  ;;  %v1449_v33 = vld [vmem:[%s2536_s9] sm:$0xff]  ;;  %v1450_v35 = vld [vmem:[%s2536_s9 + $0x8] sm:$0xff] }
 0x2ac   : > { %v1414_v51 = vsel %vm560_vm2, %v1398_v40, 0.0  ;;  %v1337_v52 = vadd.f32 %v1329_v44, %v1316_v45  ;;  %v1317_v59 = vadd.f32 %v1309_v58, %v1296_v46  ;;  %v1391_v60 = vmul.f32 %v2364_v14, %v1255_v13  ;;  %v1452_v40 = vld [vmem:[%s2536_s9 + $0x18] sm:$0xff] }
 0x2ad   : > { %1415 = vadd.xlane.f32.xlu1 %v1414_v51  ;;  %v1378_v42 = vadd.f32 %v1370_v49, %v1357_v48  ;;  %v1392_v53 = vmul.f32 %v2364_v14, %v1318_v28  ;;  %v1372_v0 = vmul.f32 %v2353_v5, %v1360_v41  ;;  %v1393_v2 = vmul.f32 %v2364_v14, %v1381_v47  ;;  %v1453_v49 = vld [vmem:[%s2536_s9 + $0x20] sm:$0xff]  ;;  %v1454_v41 = vld [vmem:[%s2536_s9 + $0x28] sm:$0xff]  ;;  %v1456_v47 = vld [vmem:[%s2536_s9 + $0x38] sm:$0xff] }
 0x2ae   : > { %v1358_v62 = vadd.f32 %v1350_v39, %v1337_v52  ;;  %v1338_v63 = vadd.f32 %v1330_v37, %v1317_v59  ;;  %v1988_v16 = vmov 0.0|0.0  }
 0x2af   : > { %v1399_v61 = vadd.f32 %v1391_v60, %v1378_v42  ;;  %1827 = vmatprep.subr.bf16.mxu0 %v1988_v16  ;;  %v1455_v42 = vld [vmem:[%s2536_s9 + $0x30] sm:$0xff] }
 0x2b0   : > { %v1379_v1 = vadd.f32 %v1371_v57, %v1358_v62  ;;  %v1359_v55 = vadd.f32 %v1351_v50, %v1338_v63 }
 0x2b1   : > { %v1417_v3 = vsel %vm560_vm2, %v1399_v61, 0.0  ;;  %v1505_v61 = vld [vmem:[%s2535_s8] sm:$0x1] }
 0x2b2   : > { %1418 = vadd.xlane.f32.xlu0 %v1417_v3  ;;  %v1400_v43 = vadd.f32 %v1392_v53, %v1379_v1  ;;  %v1380_v58 = vadd.f32 %v1372_v0, %v1359_v55  ;;  %v1506_v1 = vld [vmem:[%s2537_s10] sm:$0x1] }
 0x2b4   : > { %v1420_v4 = vsel %vm560_vm2, %v1400_v43, 0.0  ;;  %v1401_v6 = vadd.f32 %v1393_v2, %v1380_v58 }
 0x2b5   : > { %1421 = vadd.xlane.f32.xlu1 %v1420_v4 }
 0x2b6   : > { %v1423_v7 = vsel %vm560_vm2, %v1401_v6, 0.0 }
 0x2b7   : > { %1424 = vadd.xlane.f32.xlu0 %v1423_v7 }
 0x320   : > { %v1404_v9 = vpop.xlane.xlu0 %1403 }
 0x321   : > { %v1433_v5 = vadd.f32 %v1706_v8, %v1404_v9 }
 0x323   : > { %v1441_v10 = vmax.f32 %v1433_v5, 0.0 }
 0x325   : > { %1459 = vperm.xlu1 %1886, %v1441_v10  }
 0x32a   : > { %v1407_v11 = vpop.xlane.xlu1 %1406 }
 0x32b   : > { %v1434_v12 = vadd.f32 %v1706_v8, %v1407_v11 }
 0x32d   : > { %v1442_v14 = vmax.f32 %v1434_v12, 0.0 }
 0x32f   : > { %1464 = vperm.xlu0 %1885, %v1442_v14  }
 0x330   : > { %v1410_v13 = vpop.xlane.xlu0 %1409 }
 0x331   : > { %v1435_v15 = vadd.f32 %v1706_v8, %v1410_v13 }
 0x333   : > { %v1443_v54 = vmax.f32 %v1435_v15, 0.0 }
 0x335   : > { %1469 = vperm.xlu1 %1886, %v1443_v54  }
 0x336   : > { %v1413_v17 = vpop.xlane.xlu0 %1412 }
 0x337   : > { %v1436_v20 = vadd.f32 %v1706_v8, %v1413_v17 }
 0x339   : > { %v1444_v21 = vmax.f32 %v1436_v20, 0.0 }
 0x33a   : > { %v1416_v23 = vpop.xlane.xlu1 %1415 }
 0x33b   : > { %1474 = vperm.xlu1 %1886, %v1444_v21   ;;  %v1437_v24 = vadd.f32 %v1706_v8, %v1416_v23 }
 0x33d   : > { %v1445_v25 = vmax.f32 %v1437_v24, 0.0 }
 0x33f   : > { %1479 = vperm.xlu0 %1885, %v1445_v25   ;;  %v1419_v26 = vpop.xlane.xlu0 %1418 }
 0x340   : > { %v1438_v56 = vadd.f32 %v1706_v8, %v1419_v26 }
 0x342   : > { %v1446_v27 = vmax.f32 %v1438_v56, 0.0  ;;  %v1422_v28 = vpop.xlane.xlu1 %1421 }
 0x343   : > { %v1439_v29 = vadd.f32 %v1706_v8, %v1422_v28 }
 0x344   : > { %v1425_v31 = vpop.xlane.xlu0 %1424  ;;  %1484 = vperm.xlu1 %1886, %v1446_v27  }
 0x345   : > { %v1447_v19 = vmax.f32 %v1439_v29, 0.0  ;;  %v1440_v18 = vadd.f32 %v1706_v8, %v1425_v31 }
 0x347   : > { %v1448_v32 = vmax.f32 %v1440_v18, 0.0  ;;  %1489 = vperm.xlu0 %1885, %v1447_v19  }
 0x349   : > { %1494 = vperm.xlu1 %1886, %v1448_v32  }
 0x3a4   : > { %v1460_v34 = vpop.permute.xlu1 %1459 }
 0x3a5   : > { %v1497_v38 = vmul.f32 %v1460_v34, %v1449_v33 }
 0x3ae   : > { %v1465_v36 = vpop.permute.xlu0 %1464 }
 0x3af   : > { %v1498_v30 = vmul.f32 %v1465_v36, %v1450_v35 }
 0x3b1   : > { %v1828_v37 = vpack.c.bf16 %v1498_v30, %v1497_v38 }
 0x3b3   : > { %1829 = vmatpush3.bf16.msra.mxu0 %v1828_v37 }
 0x3b4   : > { %1830 = vmatprep.subr.bf16.mxu0 %v1988_v16  ;;  %v1470_v39 = vpop.permute.xlu1 %1469 }
 0x3b5   : > { %v1499_v45 = vmul.f32 %v1470_v39, %v1451_v22 }
 0x3ba   : > { %v1475_v44 = vpop.permute.xlu1 %1474 }
 0x3bb   : > { %v1500_v46 = vmul.f32 %v1475_v44, %v1452_v40 }
 0x3bd   : > { %v1831_v48 = vpack.c.bf16 %v1500_v46, %v1499_v45 }
 0x3be   : > { %v1480_v50 = vpop.permute.xlu0 %1479 }
 0x3bf   : > { %1832 = vmatpush3.bf16.msra.mxu0 %v1831_v48  ;;  %v1501_v52 = vmul.f32 %v1480_v50, %v1453_v49 }
 0x3c0   : > { %1833 = vmatprep.subr.bf16.mxu0 %v1988_v16 }
 0x3c3   : > { %v1485_v51 = vpop.permute.xlu1 %1484 }
 0x3c4   : > { %v1502_v57 = vmul.f32 %v1485_v51, %v1454_v41 }
 0x3c6   : > { %v1834_v59 = vpack.c.bf16 %v1502_v57, %v1501_v52  ;;  %v1490_v60 = vpop.permute.xlu0 %1489 }
 0x3c7   : > { %v1503_v53 = vmul.f32 %v1490_v60, %v1455_v42 }
 0x3c8   : > { %v1495_v62 = vpop.permute.xlu1 %1494  ;;  %1835 = vmatpush3.bf16.msra.mxu0 %v1834_v59 }
 0x3c9   : > { %v1504_v63 = vmul.f32 %v1495_v62, %v1456_v47  ;;  %1836 = vmatprep.subr.bf16.mxu0 %v1988_v16 }
 0x3cb   : > { %v1837_v0 = vpack.c.bf16 %v1504_v63, %v1503_v53 }
 0x3cd   : > { %1838 = vmatpush3.bf16.msra.mxu0 %v1837_v0 }
 0x3d0   : > { %1825 = vmatmul.mubr.msk.f32.vlgmr.msra.gmra.mrb[16].mxu0 %vm1507_vm9, %v1505_v61 }
 0x4a3   : > { %v1577_v55 = vpop.f32.mrb[16].mxu0 }
 0x4a4   : > { %v1578_v2 = vadd.f32 %v1577_v55, %v1506_v1  ;;  %v1826_v3 = vpop.f32.mrb[17].mxu0 }
 0x4a6   : > { %v1581_v43 = vsel %vm481_vm1, %v1578_v2, -inf }
 0x4a7   : > { %1582 = vmax.xlane.f32.xlu0 %v1581_v43 }
 0x534   : > { %v1583_v58 = vpop.xlane.xlu0 %1582 }
 0x535   : > { %v1584_v4 = vsub.f32 %v1578_v2, %v1583_v58 }
 0x537   : > { %v1585_v6 = vmul.f32 1.442695, %v1584_v4 }
 0x539   : > { %1915 = vpow2.f32 %v1585_v6 }
 0x543   : > { %v1916_v7 = vpop.eup %1915 }
 0x544   : > { %v1587_v8 = vsel %vm481_vm1, %v1916_v7, 0.0 }
 0x545   : > { %1588 = vadd.xlane.f32.xlu1 %v1587_v8 }
 0x5d2   : > { %v1589_v9 = vpop.xlane.xlu1 %1588 }
 0x5d3   : > { %1917 = vrcp.f32 %v1589_v9 }
 0x5dd   : > { %v1918_v5 = vpop.eup %1917 }
 0x5de   : > { %v1591_v10 = vmul.f32 %v1918_v5, %v1916_v7 }
 0x5e0   : > { %1592 = vst [vmem:[%s381_s18] sm:$0x1] %v1591_v10 }
 0x5e1   : > { %1932 = shalt.err (!%p1929_p3)
}
 0x5e2   : > { %s1933_s27 = scalar_lea.hbm %s2485_s30, 16  ;;  %s1937_s18 = scalar_lea.hbm %s2538_s11, 32 }
 0x5e3   : > { %p1934_p4 = scmp.ne.s32.totalorder %s2485_s30, %s1933_s27  ;;  %p1938_p9 = scmp.lt.u32.totalorder %s2485_s30, %s2538_s11 }
 0x5e4   : > { %p1939_p10 = scmp.lt.u32.totalorder %s1937_s18, %s1933_s27  ;;  %p1941_p12 = scmp.lt.u32.totalorder %s1933_s27, %s2485_s30 }
 0x5e5   : > { %p1935_p7 = pnand %p1934_p4, %p2092_p5 }
 0x5e6   : > { %p1940_p11 = por %p1939_p10, %p1938_p9 }
 0x5e7   : > { %p1936_p8 = pneg %p1935_p7 }
 0x5e8   : > { %p1942_p13 = por %p1941_p12, %p1940_p11 }
 0x5ea   : > { %p1943_p0 = pnand %p1942_p13, %p1936_p8 }
 0x5ec   : > { %1946 = shalt.err (!%p1943_p0)
}
 0x5ed   : > { %1839 = dma.vmem_to_hbm [thread:$0]  (%p2092_p5), %s2487_s23, 16, %s2485_s30, %s1594_s15  }
 0x5ee PF: > { %p1845_p1 = scmp.ge.s32.totalorder %s1981_s22, 2  ;;  %s1618_s12 = sand.u32 1, %s1969_s19  }
 0x5ef   : > { %s1619_s6 = scalar_lea.sflag [#allocation7], %s1618_s12 }
 0x5f0   : > { %p1842_p2 = pnand %p1845_p1, %p2096_p6 }
 0x5f2   : > { %1964 = dma.done.wait (!%p1842_p2), %s1619_s6, 16  }
 0x5f3   : > { %1966 = vsyncadd (!%p1842_p2), %s1619_s6, 4294967280  ;;  %s2542_s14 = sld [smem:[#allocation9_spill]]  ;;  %p23_p3 = scmp.ge.s32.totalorder %s2079_s24, 4  }
 0x5f4   : > { %s2543_s19 = smov %s1973_s20  ;;  %s2544_s20 = smov %s1977_s21 }
 0x5f5   : > { %s2546_s22 = smov %s2079_s24  ;;  %25 = sbr.rel (!%p23_p3) target bundleno = 6 (0x6), region = 99 }
 0x5f9   : > { %s2545_s21 = smov %s2542_s14 }
 0x5fc   :  { %1623 = vsyncpa [#allocation7], 1 }
 0x5fd   :  { %1625 = vsyncpa [#allocation7 + $0x1], 1 }

</bundles_post_ra>
